<compile_context>
chip_gen: v5e
topology: v5e:2x2
jax: 0.10.0
libtpu: 0.0.40
codegen_flags: <defaults>
</compile_context>

<pallas_src>
import jax
import jax.numpy as jnp
from jax.experimental import pallas as pl
from jax.experimental.pallas import tpu as pltpu


def _round_up(v, m):
    return ((v + m - 1) // m) * m


def _mlp_kernel(x_ref, cols_ref, w_ref, o_ref):
    """Full forward pass, feature-major / batch-on-lanes layout. All in VMEM.

    x_ref    : (1, B_pad)            input row (batch on lanes)
    cols_ref : (NN_pad, 8)           cols: [w_in, b_in, b_h1, b_h2, b_h3, b_out@[0,5], 0, 0]
    w_ref    : (4, NN_pad, NN_pad)   [w_h1, w_h2, w_h3, w_out(in row 0)], PyTorch (out,in) layout
    o_ref    : (1, B_pad)            output row
    """
    f32 = jnp.float32

    w_in = cols_ref[:, 0:1]     # (NN_pad, 1)
    b_in = cols_ref[:, 1:2]
    b_h1 = cols_ref[:, 2:3]
    b_h2 = cols_ref[:, 3:4]
    b_h3 = cols_ref[:, 4:5]
    b_out = cols_ref[0:1, 5:6]  # (1, 1) scalar

    # Input layer, K=1: VPU broadcast multiply-add (no degenerate MXU pass).
    x = x_ref[...].astype(f32)                      # (1, B_pad)
    h = jnp.tanh(w_in * x + b_in)                   # (NN_pad, B_pad)

    def dense_tanh(h, w, b):
        # PyTorch Linear in transposed layout: tanh(W @ h + b_col)
        return jnp.tanh(jnp.dot(w, h, preferred_element_type=f32) + b)

    h = dense_tanh(h, w_ref[0], b_h1)   # out2  (h1)
    h = dense_tanh(h, w_ref[1], b_h2)   # out3  (h2)
    h = dense_tanh(h, w_ref[2], b_h3)   # out4  (h3)
    h = dense_tanh(h, w_ref[2], b_h3)   # out5  (h3 reused)
    h = dense_tanh(h, w_ref[2], b_h3)   # out6  (h3 reused)

    # Output layer, N=1: (1, NN_pad) x (NN_pad, B_pad) on the (idle) MXU.
    w_out_row = w_ref[3][0:1, :]                    # (1, NN_pad)
    out = jnp.dot(w_out_row, h, preferred_element_type=f32) + b_out
    o_ref[...] = out.astype(o_ref.dtype)


def pack_params(params):
    """Pack PyTorch-layout weights once (call outside the forward loop)."""
    f32 = jnp.float32
    NN = params["w_h1"].shape[0]
    NN_pad = _round_up(max(NN, 8), 8)   # sublane-padded hidden width (64 for NN=60)

    # Column-packed small vectors (feature dim on sublanes).
    cols = jnp.zeros((NN_pad, 8), f32)
    cols = cols.at[:NN, 0].set(params["w_in"][:, 0].astype(f32))   # (NN,1) -> col
    cols = cols.at[:NN, 1].set(params["b_in"].astype(f32))
    cols = cols.at[:NN, 2].set(params["b_h1"].astype(f32))
    cols = cols.at[:NN, 3].set(params["b_h2"].astype(f32))
    cols = cols.at[:NN, 4].set(params["b_h3"].astype(f32))
    cols = cols.at[0, 5].set(params["b_out"].astype(f32)[0])       # scalar b_out

    # Hidden weights + output row, kept in PyTorch (out, in) layout, zero-padded.
    w_stack = jnp.zeros((4, NN_pad, NN_pad), f32)
    for idx, name in enumerate(("w_h1", "w_h2", "w_h3")):
        w_stack = w_stack.at[idx, :NN, :NN].set(params[name].astype(f32))
    w_stack = w_stack.at[3, 0, :NN].set(params["w_out"][0, :].astype(f32))

    return cols, w_stack


def net_forward_pallas(x, cols, w_stack):
    """x: (B, 1) float32; (cols, w_stack) from pack_params. Returns (B, 1)."""
    f32 = jnp.float32
    B = x.shape[0]
    NN_pad = w_stack.shape[1]
    B_pad = _round_up(max(B, 128), 128)   # batch on lanes -> lane-dense I/O

    x_row = jnp.zeros((1, B_pad), f32).at[0, :B].set(x[:, 0].astype(f32))

    out_row = pl.pallas_call(
        _mlp_kernel,
        out_shape=jax.ShapeDtypeStruct((1, B_pad), f32),
        grid_spec=pltpu.PrefetchScalarGridSpec(
            num_scalar_prefetch=0,
            grid=(1,),                                     # single whole-batch block
            in_specs=[
                pl.BlockSpec((1, B_pad), lambda i: (0, 0)),            # x row
                pl.BlockSpec((NN_pad, 8), lambda i: (0, 0)),           # packed cols
                pl.BlockSpec((4, NN_pad, NN_pad), lambda i: (0, 0, 0)),  # weights
            ],
            out_specs=pl.BlockSpec((1, B_pad), lambda i: (0, 0)),
        ),
        compiler_params=pltpu.CompilerParams(
            dimension_semantics=("arbitrary",)),
    )(x_row, cols, w_stack)

    return out_row[0, :B][:, None]


def net_forward_ref(x, params):
    """Pure-JAX reference mirroring the PyTorch forward exactly."""
    def lin(h, w, b):  # PyTorch Linear: h @ W^T + b
        return h @ w.T + b
    h = jnp.tanh(lin(x, params["w_in"], params["b_in"]))
    h = jnp.tanh(lin(h, params["w_h1"], params["b_h1"]))
    h = jnp.tanh(lin(h, params["w_h2"], params["b_h2"]))
    h = jnp.tanh(lin(h, params["w_h3"], params["b_h3"]))
    h = jnp.tanh(lin(h, params["w_h3"], params["b_h3"]))
    h = jnp.tanh(lin(h, params["w_h3"], params["b_h3"]))
    return lin(h, params["w_out"], params["b_out"])


def init_params(key, NN):
    """Deterministic synthetic init at PyTorch nn.Linear layouts (out, in)."""
    keys = jax.random.split(key, 14)

    def w(k, shape):
        return (0.1 * jax.random.normal(k, shape)).astype(jnp.float32)

    return {
        "w_in":  w(keys[0], (NN, 1)),   "b_in":  w(keys[1], (NN,)),
        "w_h1":  w(keys[2], (NN, NN)),  "b_h1":  w(keys[3], (NN,)),
        "w_h2":  w(keys[4], (NN, NN)),  "b_h2":  w(keys[5], (NN,)),
        "w_h3":  w(keys[6], (NN, NN)),  "b_h3":  w(keys[7], (NN,)),
        # h4 / h5 exist in __init__ but are unused in forward; kept for parity.
        "w_h4":  w(keys[8], (NN, NN)),  "b_h4":  w(keys[9], (NN,)),
        "w_h5":  w(keys[10], (NN, NN)), "b_h5":  w(keys[11], (NN,)),
        "w_out": w(keys[12], (1, NN)),  "b_out": w(keys[13], (1,)),
    }


if __name__ == "__main__":
    key = jax.random.PRNGKey(0)
    k_x, k_p = jax.random.split(key)

    NN = 60          # hidden width used by the original script
    B = 500          # 500 collocation points, as in the original script

    x = jax.random.uniform(k_x, (B, 1), dtype=jnp.float32)
    params = init_params(k_p, NN)

    cols, w_stack = pack_params(params)        # packed ONCE, reused across calls
    fwd = jax.jit(net_forward_pallas)

    out = jax.block_until_ready(fwd(x, cols, w_stack))

    ref = net_forward_ref(x, params)
    assert out.shape == (B, 1)
    assert jnp.allclose(out, ref, atol=5e-5, rtol=5e-5), "mismatch vs reference"

    print("KERNEL_OK")
</pallas_src>

<mosaic_0001>
module attributes {stable_mosaic.version = 11 : i64} {
  func.func @_mlp_kernel(%arg0: i32, %arg1: memref<1x512xf32, #tpu.memory_space<vmem>>, %arg2: memref<64x8xf32, #tpu.memory_space<vmem>>, %arg3: memref<4x64x64xf32, #tpu.memory_space<vmem>>, %arg4: memref<1x512xf32, #tpu.memory_space<vmem>>) attributes {dimension_semantics = [#tpu.dimension_semantics<arbitrary>], iteration_bounds = array<i64: 1>, scalar_prefetch = 0 : i64, scratch_operands = 0 : i64, tpu.core_type = #tpu.core_type<tc>, window_params = [{pipeline_mode = #tpu.pipeline_mode<synchronous>, transform_indices = @transform_0, window_bounds = array<i64: 1, 512>}, {pipeline_mode = #tpu.pipeline_mode<synchronous>, transform_indices = @transform_1, window_bounds = array<i64: 64, 8>}, {pipeline_mode = #tpu.pipeline_mode<synchronous>, transform_indices = @transform_2, window_bounds = array<i64: 4, 64, 64>}, {pipeline_mode = #tpu.pipeline_mode<synchronous>, transform_indices = @transform_3, window_bounds = array<i64: 1, 512>}]} {
    %c0 = arith.constant 0 : index
    %c0_0 = arith.constant 0 : index
    %0 = vector.load %arg2[%c0, %c0_0] : memref<64x8xf32, #tpu.memory_space<vmem>>, vector<64x1xf32>
    %c0_1 = arith.constant 0 : index
    %c1 = arith.constant 1 : index
    %1 = vector.load %arg2[%c0_1, %c1] : memref<64x8xf32, #tpu.memory_space<vmem>>, vector<64x1xf32>
    %c0_2 = arith.constant 0 : index
    %c2 = arith.constant 2 : index
    %2 = vector.load %arg2[%c0_2, %c2] : memref<64x8xf32, #tpu.memory_space<vmem>>, vector<64x1xf32>
    %c0_3 = arith.constant 0 : index
    %c3 = arith.constant 3 : index
    %3 = vector.load %arg2[%c0_3, %c3] : memref<64x8xf32, #tpu.memory_space<vmem>>, vector<64x1xf32>
    %c0_4 = arith.constant 0 : index
    %c4 = arith.constant 4 : index
    %4 = vector.load %arg2[%c0_4, %c4] : memref<64x8xf32, #tpu.memory_space<vmem>>, vector<64x1xf32>
    %c0_5 = arith.constant 0 : index
    %c5 = arith.constant 5 : index
    %5 = vector.load %arg2[%c0_5, %c5] : memref<64x8xf32, #tpu.memory_space<vmem>>, vector<1x1xf32>
    %c0_6 = arith.constant 0 : index
    %c0_7 = arith.constant 0 : index
    %6 = vector.load %arg1[%c0_6, %c0_7] : memref<1x512xf32, #tpu.memory_space<vmem>>, vector<1x512xf32>
    %7 = vector.broadcast %0 : vector<64x1xf32> to vector<64x512xf32>
    %8 = vector.broadcast %6 : vector<1x512xf32> to vector<64x512xf32>
    %9 = arith.mulf %7, %8 : vector<64x512xf32>
    %10 = vector.broadcast %1 : vector<64x1xf32> to vector<64x512xf32>
    %11 = arith.addf %9, %10 : vector<64x512xf32>
    %12 = math.tanh %11 : vector<64x512xf32>
    %c0_8 = arith.constant 0 : index
    %c0_9 = arith.constant 0 : index
    %c0_10 = arith.constant 0 : index
    %13 = vector.load %arg3[%c0_8, %c0_9, %c0_10] : memref<4x64x64xf32, #tpu.memory_space<vmem>>, vector<1x64x64xf32>
    %14 = vector.shape_cast %13 : vector<1x64x64xf32> to vector<64x64xf32>
    %cst = arith.constant dense<0.000000e+00> : vector<64x512xf32>
    %15 = tpu.matmul %14, %12, %cst {dimension_numbers = #tpu.dot_dimension_numbers<[1], [0], [0], [1], [0, 0, 1, 1], [], []>} : vector<64x64xf32>, vector<64x512xf32>, vector<64x512xf32> -> vector<64x512xf32>
    %16 = vector.broadcast %2 : vector<64x1xf32> to vector<64x512xf32>
    %17 = arith.addf %15, %16 : vector<64x512xf32>
    %18 = math.tanh %17 : vector<64x512xf32>
    %c1_11 = arith.constant 1 : index
    %c0_12 = arith.constant 0 : index
    %c0_13 = arith.constant 0 : index
    %19 = vector.load %arg3[%c1_11, %c0_12, %c0_13] : memref<4x64x64xf32, #tpu.memory_space<vmem>>, vector<1x64x64xf32>
    %20 = vector.shape_cast %19 : vector<1x64x64xf32> to vector<64x64xf32>
    %cst_14 = arith.constant dense<0.000000e+00> : vector<64x512xf32>
    %21 = tpu.matmul %20, %18, %cst_14 {dimension_numbers = #tpu.dot_dimension_numbers<[1], [0], [0], [1], [0, 0, 1, 1], [], []>} : vector<64x64xf32>, vector<64x512xf32>, vector<64x512xf32> -> vector<64x512xf32>
    %22 = vector.broadcast %3 : vector<64x1xf32> to vector<64x512xf32>
    %23 = arith.addf %21, %22 : vector<64x512xf32>
    %24 = math.tanh %23 : vector<64x512xf32>
    %c2_15 = arith.constant 2 : index
    %c0_16 = arith.constant 0 : index
    %c0_17 = arith.constant 0 : index
    %25 = vector.load %arg3[%c2_15, %c0_16, %c0_17] : memref<4x64x64xf32, #tpu.memory_space<vmem>>, vector<1x64x64xf32>
    %26 = vector.shape_cast %25 : vector<1x64x64xf32> to vector<64x64xf32>
    %cst_18 = arith.constant dense<0.000000e+00> : vector<64x512xf32>
    %27 = tpu.matmul %26, %24, %cst_18 {dimension_numbers = #tpu.dot_dimension_numbers<[1], [0], [0], [1], [0, 0, 1, 1], [], []>} : vector<64x64xf32>, vector<64x512xf32>, vector<64x512xf32> -> vector<64x512xf32>
    %28 = vector.broadcast %4 : vector<64x1xf32> to vector<64x512xf32>
    %29 = arith.addf %27, %28 : vector<64x512xf32>
    %30 = math.tanh %29 : vector<64x512xf32>
    %c2_19 = arith.constant 2 : index
    %c0_20 = arith.constant 0 : index
    %c0_21 = arith.constant 0 : index
    %31 = vector.load %arg3[%c2_19, %c0_20, %c0_21] : memref<4x64x64xf32, #tpu.memory_space<vmem>>, vector<1x64x64xf32>
    %32 = vector.shape_cast %31 : vector<1x64x64xf32> to vector<64x64xf32>
    %cst_22 = arith.constant dense<0.000000e+00> : vector<64x512xf32>
    %33 = tpu.matmul %32, %30, %cst_22 {dimension_numbers = #tpu.dot_dimension_numbers<[1], [0], [0], [1], [0, 0, 1, 1], [], []>} : vector<64x64xf32>, vector<64x512xf32>, vector<64x512xf32> -> vector<64x512xf32>
    %34 = vector.broadcast %4 : vector<64x1xf32> to vector<64x512xf32>
    %35 = arith.addf %33, %34 : vector<64x512xf32>
    %36 = math.tanh %35 : vector<64x512xf32>
    %c2_23 = arith.constant 2 : index
    %c0_24 = arith.constant 0 : index
    %c0_25 = arith.constant 0 : index
    %37 = vector.load %arg3[%c2_23, %c0_24, %c0_25] : memref<4x64x64xf32, #tpu.memory_space<vmem>>, vector<1x64x64xf32>
    %38 = vector.shape_cast %37 : vector<1x64x64xf32> to vector<64x64xf32>
    %cst_26 = arith.constant dense<0.000000e+00> : vector<64x512xf32>
    %39 = tpu.matmul %38, %36, %cst_26 {dimension_numbers = #tpu.dot_dimension_numbers<[1], [0], [0], [1], [0, 0, 1, 1], [], []>} : vector<64x64xf32>, vector<64x512xf32>, vector<64x512xf32> -> vector<64x512xf32>
    %40 = vector.broadcast %4 : vector<64x1xf32> to vector<64x512xf32>
    %41 = arith.addf %39, %40 : vector<64x512xf32>
    %42 = math.tanh %41 : vector<64x512xf32>
    %c3_27 = arith.constant 3 : index
    %c0_28 = arith.constant 0 : index
    %c0_29 = arith.constant 0 : index
    %43 = vector.load %arg3[%c3_27, %c0_28, %c0_29] : memref<4x64x64xf32, #tpu.memory_space<vmem>>, vector<1x64x64xf32>
    %44 = vector.shape_cast %43 : vector<1x64x64xf32> to vector<64x64xf32>
    %45 = vector.extract_strided_slice %44 {offsets = [0, 0], sizes = [1, 64], strides = [1, 1]} : vector<64x64xf32> to vector<1x64xf32>
    %cst_30 = arith.constant dense<0.000000e+00> : vector<1x512xf32>
    %46 = tpu.matmul %45, %42, %cst_30 {dimension_numbers = #tpu.dot_dimension_numbers<[1], [0], [0], [1], [0, 0, 1, 1], [], []>} : vector<1x64xf32>, vector<64x512xf32>, vector<1x512xf32> -> vector<1x512xf32>
    %47 = vector.broadcast %5 : vector<1x1xf32> to vector<1x512xf32>
    %48 = arith.addf %46, %47 : vector<1x512xf32>
    %c0_31 = arith.constant 0 : index
    %c0_32 = arith.constant 0 : index
    %49 = vector.load %arg4[%c0_31, %c0_32] : memref<1x512xf32, #tpu.memory_space<vmem>>, vector<1x512xf32>
    tpu.vector_store %arg4[%c0_31, %c0_32], %48 {strides = array<i32>} : memref<1x512xf32, #tpu.memory_space<vmem>>, vector<1x512xf32>,
    return
  }
  func.func @transform_0(%arg0: i32) -> (i32, i32) {
    %c0_i32 = arith.constant 0 : i32
    %c0_i32_0 = arith.constant 0 : i32
    %c0_i32_1 = arith.constant 0 : i32
    return %c0_i32, %c0_i32_0 : i32, i32
  }
  func.func @transform_1(%arg0: i32) -> (i32, i32) {
    %c0_i32 = arith.constant 0 : i32
    %c0_i32_0 = arith.constant 0 : i32
    %c0_i32_1 = arith.constant 0 : i32
    return %c0_i32, %c0_i32_0 : i32, i32
  }
  func.func @transform_2(%arg0: i32) -> (i32, i32, i32) {
    %c0_i32 = arith.constant 0 : i32
    %c0_i32_0 = arith.constant 0 : i32
    %c0_i32_1 = arith.constant 0 : i32
    %c0_i32_2 = arith.constant 0 : i32
    return %c0_i32, %c0_i32_0, %c0_i32_1 : i32, i32, i32
  }
  func.func @transform_3(%arg0: i32) -> (i32, i32) {
    %c0_i32 = arith.constant 0 : i32
    %c0_i32_0 = arith.constant 0 : i32
    %c0_i32_1 = arith.constant 0 : i32
    return %c0_i32, %c0_i32_0 : i32, i32
  }
}

</mosaic_0001>

<bundles_post_ra>
// kernel: net_forward_pallas.1
= control target key start
LH: loop header
LB: loop body
LE: loop exit
PB: predicated region body
PF: predicated region fallthrough
CT: control target
= control target key end

     0   :  { %8 = vsyncpa [#allocation3], 0  ;;  %s2118_s15 = smov [#allocation2]   ;;  %s2119_s17 = smov 128   ;;  %s2986_s0 = inlined_call_operand.vmem [shape: f32[1,512], index: 0, kind: input, shape index: {}]   ;;  %s2987_s1 = inlined_call_operand.vmem [shape: f32[64,8], index: 1, kind: input, shape index: {}]   ;;  %s2988_s2 = inlined_call_operand.hbm [shape: f32[4,64,64], index: 2, kind: input, shape index: {}]   ;;  %s2989_s3 = inlined_call_operand.vmem [shape: f32[1,512], index: 3, kind: output, shape index: {}]  }
   0x1   :  { %s17_s14 = sshll.u32 %s2988_s2, 4  ;;  %s19_s16 = sshll.u32 %s2118_s15, 4  ;;  %s18_s14 = int_to_ptr.hbm [resolvable:$true] %s17_s14  ;;  %s20_s16 = int_to_ptr.vmem [resolvable:$true] %s19_s16 }
   0x2   :  { %s2120_s18 = smov 8  }
   0x3   :  { %25 = dma.hbm_to_vmem [thread:$0]  %s18_s14, 4096, %s20_s16, [#allocation3], %s2119_s17, %s2119_s17, %s2120_s18  }
   0x4   :  { %2116 = dma.done.wait [#allocation3], 4096  }
   0x5   :  { %2117 = vsyncadd [#allocation3], 4294963200  ;;  %v2121_v0 = vmov 1   ;;  %v2122_v1 = vmov 0   ;;  %v2153_v2 = vld [vmem:[%s2987_s1 + $0x38] sm:$0xff]  ;;  %v2160_v3 = vld [vmem:[%s2987_s1 + $0x30] sm:$0xff] }
   0x6   :  { %1680 = vset.pattern.permute.xlu1 %v2121_v0  ;;  %1679 = vset.pattern.permute.xlu0 %v2122_v1  ;;  %v2166_v4 = vld [vmem:[%s2987_s1 + $0x28] sm:$0xff]  ;;  %v2171_v5 = vld [vmem:[%s2987_s1 + $0x20] sm:$0xff]  ;;  %v2179_v6 = vld [vmem:[%s2987_s1 + $0x18] sm:$0xff]  ;;  %vm257_vm0 = vcmask 523264   ;;  %vm1491_vm1 = vcmask 1042434   ;;  %vm1489_vm2 = vcmask 1040384  }
   0x7   :  { %1682 = vset.pattern.permute.xlu2 %v2121_v0  ;;  %150 = vperm.xlu1 %1680, %v2153_v2   ;;  %v2187_v7 = vld [vmem:[%s2987_s1 + $0x10] sm:$0xff]  ;;  %v2192_v8 = vld [vmem:[%s2987_s1 + $0x8] sm:$0xff]  ;;  %v2200_v9 = vld [vmem:[%s2987_s1] sm:$0xff]  ;;  %vm1493_vm3 = vcmask 1041408  }
   0x8   :  { %77 = vperm.xlu0 %1679, %v2153_v2   ;;  %146 = vperm.xlu2 %1682, %v2160_v3   ;;  %v39_v12 = vld [vmem:[%s2986_s0] sm:$0xf] }
   0x9   :  { %v2209_v13 = vperm.slane %v39_v12, 0  ;;  %v2211_v14 = vperm.slane %v39_v12, 1  ;;  %v2213_v15 = vperm.slane %v39_v12, 2  ;;  %v2215_v16 = vperm.slane %v39_v12, 3 }
   0xf   :  { %1681 = vset.pattern.permute.xlu1 %v2122_v1 }
  0x10   :  { %72 = vperm.xlu0 %1679, %v2160_v3   ;;  %67 = vperm.xlu1 %1681, %v2166_v4  }
  0x11   :  { %1683 = vset.pattern.permute.xlu2 %v2122_v1 }
  0x12   :  { %62 = vperm.xlu2 %1683, %v2171_v5  }
  0x18   :  { %1684 = vset.pattern.permute.xlu0 %v2121_v0  ;;  %57 = vperm.xlu1 %1681, %v2179_v6  }
  0x19   :  { %142 = vperm.xlu0 %1684, %v2166_v4  }
  0x1a   :  { %1685 = vset.pattern.permute.xlu2 %v2121_v0 }
  0x1b   :  { %138 = vperm.xlu2 %1685, %v2171_v5  }
  0x20   :  { %52 = vperm.xlu1 %1681, %v2187_v7  }
  0x21   :  { %1686 = vset.pattern.permute.xlu0 %v2122_v1 }
  0x22   :  { %47 = vperm.xlu0 %1686, %v2192_v8  }
  0x23   :  { %134 = vperm.xlu2 %1685, %v2179_v6  }
  0x28   :  { %1687 = vset.pattern.permute.xlu1 %v2121_v0 }
  0x29   :  { %130 = vperm.xlu1 %1687, %v2187_v7  }
  0x2b   :  { %1688 = vset.pattern.permute.xlu2 %v2122_v1 }
  0x2c   :  { %42 = vperm.xlu2 %1688, %v2200_v9  }
  0x31   :  { %126 = vperm.xlu1 %1687, %v2192_v8  }
  0x34   :  { %1689 = vset.pattern.permute.xlu2 %v2121_v0 }
  0x35   :  { %122 = vperm.xlu2 %1689, %v2200_v9  }
  0x62   :  { %v147_v10 = vpop.permute.xlu2 %146 }
  0x6c   :  { %v63_v11 = vpop.permute.xlu2 %62 }
  0x6d   :  { %v105_v22 = vmul.f32 %v2209_v13, %v63_v11  ;;  %v106_v24 = vmul.f32 %v2211_v14, %v63_v11  ;;  %v107_v29 = vmul.f32 %v2213_v15, %v63_v11  ;;  %v108_v33 = vmul.f32 %v2215_v16, %v63_v11 }
  0x75   :  { %v139_v25 = vpop.permute.xlu2 %138 }
  0x76   :  { %v169_v31 = vadd.f32 %v139_v25, %v105_v22  ;;  %v170_v32 = vadd.f32 %v139_v25, %v106_v24  ;;  %v171_v35 = vadd.f32 %v139_v25, %v107_v29  ;;  %v172_v48 = vadd.f32 %v139_v25, %v108_v33 }
  0x79   :  { %v151_v17 = vpop.permute.xlu1 %150 }
  0x7a   :  { %v78_v18 = vpop.permute.xlu0 %77 }
  0x7b   :  { %v117_v19 = vmul.f32 %v2209_v13, %v78_v18  ;;  %v118_v20 = vmul.f32 %v2211_v14, %v78_v18  ;;  %v119_v21 = vmul.f32 %v2213_v15, %v78_v18  ;;  %v120_v23 = vmul.f32 %v2215_v16, %v78_v18 }
  0x7d   :  { %v181_v26 = vadd.f32 %v151_v17, %v117_v19  ;;  %v182_v27 = vadd.f32 %v151_v17, %v118_v20  ;;  %v183_v28 = vadd.f32 %v151_v17, %v119_v21  ;;  %v184_v30 = vadd.f32 %v151_v17, %v120_v23  ;;  %v135_v55 = vpop.permute.xlu2 %134 }
  0x7f   :  { %1700 = vtanh.f32 %v181_v26 }
  0x80   :  { %1702 = vtanh.f32 %v182_v27 }
  0x81   :  { %1704 = vtanh.f32 %v183_v28 }
  0x82   :  { %v73_v34 = vpop.permute.xlu0 %72  ;;  %1706 = vtanh.f32 %v184_v30  ;;  %v68_v40 = vpop.permute.xlu1 %67 }
  0x83   :  { %v113_v36 = vmul.f32 %v2209_v13, %v73_v34  ;;  %v114_v37 = vmul.f32 %v2211_v14, %v73_v34  ;;  %v115_v38 = vmul.f32 %v2213_v15, %v73_v34  ;;  %v116_v39 = vmul.f32 %v2215_v16, %v73_v34 }
  0x84   :  { %1708 = vtanh.f32 %v169_v31  ;;  %v109_v50 = vmul.f32 %v2209_v13, %v68_v40  ;;  %v110_v52 = vmul.f32 %v2211_v14, %v68_v40  ;;  %v111_v53 = vmul.f32 %v2213_v15, %v68_v40 }
  0x85   :  { %v1701_v41 = vpop.eup %1700  ;;  %1710 = vtanh.f32 %v170_v32  ;;  %v177_v42 = vadd.f32 %v147_v10, %v113_v36  ;;  %v178_v43 = vadd.f32 %v147_v10, %v114_v37  ;;  %v179_v44 = vadd.f32 %v147_v10, %v115_v38 }
  0x86   :  { %v1703_v45 = vpop.eup %1702  ;;  %1712 = vtanh.f32 %v171_v35  ;;  %290 = vmatpush.msra.mxu0 %v1701_v41  ;;  %v180_v46 = vadd.f32 %v147_v10, %v116_v39  ;;  %v112_v54 = vmul.f32 %v2215_v16, %v68_v40  ;;  %v43_v26 = vpop.permute.xlu2 %42  ;;  %v2123_v38 = vmov 2  }
  0x87   :  { %v1705_v47 = vpop.eup %1704  ;;  %331 = vmatpush.msra.mxu1 %v1703_v45  ;;  %1714 = vtanh.f32 %v177_v42  ;;  %1691 = vset.pattern.permute.xlu1 %v2123_v38  ;;  %v89_v40 = vmul.f32 %v2209_v13, %v43_v26 }
  0x88   :  { %v1707_v49 = vpop.eup %1706  ;;  %372 = vmatpush.msra.mxu2 %v1705_v47  ;;  %1716 = vtanh.f32 %v178_v43  ;;  %250 = vperm.xlu1 %1691, %v2160_v3  }
  0x89   :  { %413 = vmatpush.msra.mxu3 %v1707_v49  ;;  %1718 = vtanh.f32 %v179_v44  ;;  %1690 = vset.pattern.permute.xlu0 %v2123_v38 }
  0x8a   :  { %v1709_v51 = vpop.eup %1708  ;;  %1720 = vtanh.f32 %v180_v46  ;;  %v58_v58 = vpop.permute.xlu1 %57  ;;  %v90_v46 = vmul.f32 %v2211_v14, %v43_v26  ;;  %1692 = vset.pattern.permute.xlu2 %v2123_v38  ;;  %254 = vperm.xlu0 %1690, %v2153_v2  }
  0x8b   :  { %v1711_v56 = vpop.eup %1710  ;;  %1722 = vtanh.f32 %v172_v48  ;;  %v143_v57 = vpop.permute.xlu0 %142  ;;  %v101_v1 = vmul.f32 %v2209_v13, %v58_v58  ;;  %v102_v10 = vmul.f32 %v2211_v14, %v58_v58  ;;  %v103_v11 = vmul.f32 %v2213_v15, %v58_v58  ;;  %246 = vperm.xlu2 %1692, %v2166_v4  }
  0x8c   :  { %v1713_v59 = vpop.eup %1712  ;;  %v173_v60 = vadd.f32 %v143_v57, %v109_v50  ;;  %v174_v61 = vadd.f32 %v143_v57, %v110_v52  ;;  %v175_v62 = vadd.f32 %v143_v57, %v111_v53  ;;  %v176_v63 = vadd.f32 %v143_v57, %v112_v54 }
  0x8d   :  { %v1715_v0 = vpop.eup %1714  ;;  %v104_v12 = vmul.f32 %v2215_v16, %v58_v58  ;;  %v165_v19 = vadd.f32 %v135_v55, %v101_v1  ;;  %v166_v20 = vadd.f32 %v135_v55, %v102_v10  ;;  %v167_v22 = vadd.f32 %v135_v55, %v103_v11 }
  0x8e   :  { %v1717_v17 = vpop.eup %1716  ;;  %1724 = vtanh.f32 %v173_v60  ;;  %291 = vmatpush.msra.mxu0 %v1715_v0 }
  0x8f   :  { %v1719_v18 = vpop.eup %1718  ;;  %1726 = vtanh.f32 %v174_v61  ;;  %332 = vmatpush.msra.mxu1 %v1717_v17  ;;  %v168_v24 = vadd.f32 %v135_v55, %v104_v12  ;;  %v123_v45 = vpop.permute.xlu2 %122  ;;  %v91_v55 = vmul.f32 %v2213_v15, %v43_v26  ;;  %v217_v17 = vld [vmem:[#allocation2] sm:$0xff] }
  0x90   :  { %v1721_v21 = vpop.eup %1720  ;;  %1728 = vtanh.f32 %v175_v62  ;;  %373 = vmatpush.msra.mxu2 %v1719_v18  ;;  %v153_v49 = vadd.f32 %v123_v45, %v89_v40  ;;  %v154_v53 = vadd.f32 %v123_v45, %v90_v46  ;;  %242 = vperm.xlu1 %1691, %v2171_v5  }
  0x91   :  { %v1723_v23 = vpop.eup %1722  ;;  %1730 = vtanh.f32 %v176_v63  ;;  %414 = vmatpush.msra.mxu3 %v1721_v21  ;;  %v155_v63 = vadd.f32 %v123_v45, %v91_v55  ;;  %v218_v21 = vld [vmem:[#allocation2 + $0x8] sm:$0xff] }
  0x92   :  { %1732 = vtanh.f32 %v165_v19  ;;  %v53_v25 = vpop.permute.xlu1 %52  ;;  %234 = vperm.xlu0 %1690, %v2187_v7  }
  0x93   :  { %1734 = vtanh.f32 %v166_v20  ;;  %v97_v35 = vmul.f32 %v2209_v13, %v53_v25  ;;  %v98_v36 = vmul.f32 %v2211_v14, %v53_v25  ;;  %v99_v37 = vmul.f32 %v2213_v15, %v53_v25  ;;  %238 = vperm.xlu2 %1692, %v2179_v6  }
  0x94   :  { %v1725_v27 = vpop.eup %1724  ;;  %1736 = vtanh.f32 %v167_v22  ;;  %v100_v39 = vmul.f32 %v2215_v16, %v53_v25  ;;  %v48_v48 = vpop.permute.xlu0 %47  ;;  %v219_v22 = vld [vmem:[#allocation2 + $0x10] sm:$0xff]  ;;  %v222_v25 = vld [vmem:[#allocation2 + $0x28] sm:$0xff] }
  0x95   :  { %v1727_v28 = vpop.eup %1726  ;;  %1738 = vtanh.f32 %v168_v24  ;;  %292 = vmatpush.msra.mxu0 %v1725_v27  ;;  %v93_v50 = vmul.f32 %v2209_v13, %v48_v48  ;;  %v95_v52 = vmul.f32 %v2213_v15, %v48_v48  ;;  %v96_v54 = vmul.f32 %v2215_v16, %v48_v48  ;;  %v221_v24 = vld [vmem:[#allocation2 + $0x20] sm:$0xff]  ;;  %v224_v27 = vld [vmem:[#allocation2 + $0x38] sm:$0xff] }
  0x96   :  { %v1729_v29 = vpop.eup %1728  ;;  %333 = vmatpush.msra.mxu1 %v1727_v28 }
  0x97   :  { %v1731_v30 = vpop.eup %1730  ;;  %374 = vmatpush.msra.mxu2 %v1729_v29  ;;  %293 = vmatpush.msra.mxu0 %v1709_v51  ;;  %v94_v51 = vmul.f32 %v2211_v14, %v48_v48 }
  0x98   :  { %v1733_v31 = vpop.eup %1732  ;;  %415 = vmatpush.msra.mxu3 %v1731_v30  ;;  %334 = vmatpush.msra.mxu1 %v1711_v56  ;;  %v92_v56 = vmul.f32 %v2215_v16, %v43_v26  ;;  %v223_v26 = vld [vmem:[#allocation2 + $0x30] sm:$0xff] }
  0x99   :  { %v1735_v32 = vpop.eup %1734  ;;  %375 = vmatpush.msra.mxu2 %v1713_v59  ;;  %294 = vmatpush.msra.mxu0 %v1733_v31 }
  0x9a   :  { %v1737_v33 = vpop.eup %1736  ;;  %416 = vmatpush.msra.mxu3 %v1723_v23  ;;  %335 = vmatpush.msra.mxu1 %v1735_v32  ;;  %v156_v16 = vadd.f32 %v123_v45, %v92_v56  ;;  %v220_v23 = vld [vmem:[#allocation2 + $0x18] sm:$0xff] }
  0x9b   :  { %v1739_v34 = vpop.eup %1738  ;;  %376 = vmatpush.msra.mxu2 %v1737_v33  ;;  %v131_v41 = vpop.permute.xlu1 %130  ;;  %230 = vperm.xlu1 %1691, %v2192_v8  }
  0x9c   :  { %417 = vmatpush.msra.mxu3 %v1739_v34  ;;  %v161_v42 = vadd.f32 %v131_v41, %v97_v35  ;;  %v162_v43 = vadd.f32 %v131_v41, %v98_v36  ;;  %v163_v44 = vadd.f32 %v131_v41, %v99_v37  ;;  %v164_v47 = vadd.f32 %v131_v41, %v100_v39 }
  0x9d   :  { %226 = vperm.xlu2 %1692, %v2200_v9  }
  0x9e   :  { %1740 = vtanh.f32 %v161_v42 }
  0x9f   :  { %1742 = vtanh.f32 %v162_v43 }
  0xa0   :  { %1744 = vtanh.f32 %v163_v44 }
  0xa1   :  { %1746 = vtanh.f32 %v164_v47 }
  0xa2   :  { %1748 = vtanh.f32 %v153_v49 }
  0xa3   :  { %v127_v57 = vpop.permute.xlu1 %126  ;;  %1750 = vtanh.f32 %v154_v53 }
  0xa4   :  { %v1741_v58 = vpop.eup %1740  ;;  %v157_v59 = vadd.f32 %v127_v57, %v93_v50  ;;  %v158_v60 = vadd.f32 %v127_v57, %v94_v51  ;;  %v159_v13 = vadd.f32 %v127_v57, %v95_v52  ;;  %v160_v14 = vadd.f32 %v127_v57, %v96_v54 }
  0xa5   :  { %v1743_v61 = vpop.eup %1742  ;;  %295 = vmatpush.msra.mxu0 %v1741_v58 }
  0xa6   :  { %v1745_v62 = vpop.eup %1744  ;;  %1752 = vtanh.f32 %v157_v59  ;;  %336 = vmatpush.msra.mxu1 %v1743_v61 }
  0xa7   :  { %v1747_v15 = vpop.eup %1746  ;;  %1754 = vtanh.f32 %v158_v60  ;;  %377 = vmatpush.msra.mxu2 %v1745_v62 }
  0xa8   :  { %1756 = vtanh.f32 %v159_v13  ;;  %418 = vmatpush.msra.mxu3 %v1747_v15  ;;  %v1749_v0 = vpop.eup %1748 }
  0xa9   :  { %1758 = vtanh.f32 %v160_v14  ;;  %v1751_v1 = vpop.eup %1750 }
  0xaa   :  { %1760 = vtanh.f32 %v155_v63 }
  0xab   :  { %1762 = vtanh.f32 %v156_v16 }
  0xac   :  { %v1753_v10 = vpop.eup %1752 }
  0xad   :  { %v1755_v11 = vpop.eup %1754  ;;  %296 = vmatpush.msra.mxu0 %v1753_v10 }
  0xae   :  { %v1757_v12 = vpop.eup %1756  ;;  %337 = vmatpush.msra.mxu1 %v1755_v11 }
  0xaf   :  { %v1759_v18 = vpop.eup %1758  ;;  %378 = vmatpush.msra.mxu2 %v1757_v12  ;;  %297 = vmatpush.msra.mxu0 %v1749_v0 }
  0xb0   :  { %v1761_v19 = vpop.eup %1760  ;;  %419 = vmatpush.msra.mxu3 %v1759_v18  ;;  %338 = vmatpush.msra.mxu1 %v1751_v1 }
  0xb1   :  { %v1763_v20 = vpop.eup %1762  ;;  %379 = vmatpush.msra.mxu2 %v1761_v19  ;;  %1506 = vmatmul.msk.f32.vlgmr.msra.gmra.mxu0 %vm257_vm0, %v217_v17 }
  0xb2   :  { %420 = vmatpush.msra.mxu3 %v1763_v20  ;;  %1514 = vmatmul.msk.f32.vlgmr.msra.gmra.mxu1 %vm257_vm0, %v217_v17 }
  0xb3   :  { %1522 = vmatmul.msk.f32.vlgmr.msra.gmra.mxu2 %vm257_vm0, %v217_v17  ;;  %1530 = vmatmul.msk.f32.vlgmr.msra.gmra.mxu3 %vm257_vm0, %v217_v17 }
  0xb9   :  { %1507 = vmatmul.msk.f32.gmra.mxu0 %vm257_vm0, %v218_v21 }
  0xba   :  { %1515 = vmatmul.msk.f32.gmra.mxu1 %vm257_vm0, %v218_v21 }
  0xbb   :  { %1523 = vmatmul.msk.f32.gmra.mxu2 %vm257_vm0, %v218_v21  ;;  %1531 = vmatmul.msk.f32.gmra.mxu3 %vm257_vm0, %v218_v21 }
  0xc1   :  { %1508 = vmatmul.msk.f32.gmra.mxu0 %vm257_vm0, %v219_v22 }
  0xc2   :  { %1516 = vmatmul.msk.f32.gmra.mxu1 %vm257_vm0, %v219_v22 }
  0xc3   :  { %1524 = vmatmul.msk.f32.gmra.mxu2 %vm257_vm0, %v219_v22  ;;  %1532 = vmatmul.msk.f32.gmra.mxu3 %vm257_vm0, %v219_v22 }
  0xc9   :  { %1509 = vmatmul.msk.f32.gmra.mxu0 %vm257_vm0, %v220_v23 }
  0xca   :  { %1517 = vmatmul.msk.f32.gmra.mxu1 %vm257_vm0, %v220_v23 }
  0xcb   :  { %1525 = vmatmul.msk.f32.gmra.mxu2 %vm257_vm0, %v220_v23  ;;  %1533 = vmatmul.msk.f32.gmra.mxu3 %vm257_vm0, %v220_v23 }
  0xd1   :  { %1510 = vmatmul.msk.f32.gmra.mxu0 %vm257_vm0, %v221_v24 }
  0xd2   :  { %1518 = vmatmul.msk.f32.gmra.mxu1 %vm257_vm0, %v221_v24 }
  0xd3   :  { %1526 = vmatmul.msk.f32.gmra.mxu2 %vm257_vm0, %v221_v24  ;;  %1534 = vmatmul.msk.f32.gmra.mxu3 %vm257_vm0, %v221_v24 }
  0xd9   :  { %1511 = vmatmul.msk.f32.gmra.mxu0 %vm257_vm0, %v222_v25 }
  0xda   :  { %1519 = vmatmul.msk.f32.gmra.mxu1 %vm257_vm0, %v222_v25 }
  0xdb   :  { %1527 = vmatmul.msk.f32.gmra.mxu2 %vm257_vm0, %v222_v25  ;;  %1535 = vmatmul.msk.f32.gmra.mxu3 %vm257_vm0, %v222_v25 }
  0xe1   :  { %1512 = vmatmul.msk.f32.gmra.mxu0 %vm257_vm0, %v223_v26 }
  0xe2   :  { %1520 = vmatmul.msk.f32.gmra.mxu1 %vm257_vm0, %v223_v26 }
  0xe3   :  { %1528 = vmatmul.msk.f32.gmra.mxu2 %vm257_vm0, %v223_v26  ;;  %1536 = vmatmul.msk.f32.gmra.mxu3 %vm257_vm0, %v223_v26 }
  0xe5   :  { %v2301_v42 = vpop.permute.xlu2 %246 }
  0xe9   :  { %1513 = vmatmul.msk.f32.gmra.mxu0 %vm257_vm0, %v224_v27 }
  0xea   :  { %1521 = vmatmul.msk.f32.gmra.mxu1 %vm257_vm0, %v224_v27 }
  0xeb   :  { %1529 = vmatmul.msk.f32.gmra.mxu2 %vm257_vm0, %v224_v27  ;;  %1537 = vmatmul.msk.f32.gmra.mxu3 %vm257_vm0, %v224_v27 }
  0xed   :  { %v2309_v48 = vpop.permute.xlu2 %238 }
  0xf7   :  { %v2319_v55 = vpop.permute.xlu2 %226 }
  0xfa   :  { %v2303_v43 = vpop.permute.xlu1 %250 }
  0xfc   :  { %v2313_v50 = vpop.permute.xlu0 %254 }
 0x102   :  { %v2311_v49 = vpop.permute.xlu1 %242 }
 0x104   :  { %v2331_v63 = vpop.permute.xlu0 %234 }
 0x10d   :  { %v2322_v57 = vpop.permute.xlu1 %230 }
 0x12e   :  { %v299_v28 = vpop.f32.mrf.mxu0 }
 0x12f   :  { %v340_v29 = vpop.f32.mrf.mxu1  ;;  %v300_v56 = vadd.f32 %v299_v28, %v2319_v55 }
 0x130   :  { %v341_v58 = vadd.f32 %v340_v29, %v2319_v55 }
 0x131   :  { %1764 = vtanh.f32 %v300_v56 }
 0x132   :  { %1766 = vtanh.f32 %v341_v58 }
 0x136   :  { %v2289_v30 = vpop.f32.mrf.mxu2  ;;  %v2291_v31 = vpop.f32.mrf.mxu3 }
 0x137   :  { %v302_v32 = vpop.f32.mrf.mxu0  ;;  %v343_v33 = vpop.f32.mrf.mxu1 }
 0x138   :  { %v303_v13 = vadd.f32 %v302_v32, %v2322_v57  ;;  %v344_v62 = vadd.f32 %v343_v33, %v2322_v57  ;;  %v2339_v18 = vpop.eup %1764  ;;  %v2124_v32 = vmov 3  }
 0x139   :  { %v2341_v21 = vpop.eup %1766  ;;  %1694 = vset.pattern.permute.xlu1 %v2124_v32  ;;  %1693 = vset.pattern.permute.xlu0 %v2124_v32 }
 0x13a   :  { %1768 = vtanh.f32 %v303_v13  ;;  %512 = vperm.xlu1 %1694, %v2160_v3   ;;  %1695 = vset.pattern.permute.xlu2 %v2124_v32 }
 0x13b   :  { %1770 = vtanh.f32 %v344_v62  ;;  %516 = vperm.xlu0 %1693, %v2153_v2   ;;  %508 = vperm.xlu2 %1695, %v2166_v4  }
 0x13e   :  { %v2293_v34 = vpop.f32.mrf.mxu2  ;;  %v2295_v35 = vpop.f32.mrf.mxu3 }
 0x13f   :  { %v305_v36 = vpop.f32.mrf.mxu0  ;;  %v346_v37 = vpop.f32.mrf.mxu1 }
 0x140   :  { %v306_v15 = vadd.f32 %v305_v36, %v2331_v63  ;;  %v347_v16 = vadd.f32 %v346_v37, %v2331_v63  ;;  %v2345_v24 = vpop.eup %1768 }
 0x141   :  { %v2348_v26 = vpop.eup %1770 }
 0x142   :  { %1772 = vtanh.f32 %v306_v15  ;;  %504 = vperm.xlu1 %1694, %v2171_v5  }
 0x143   :  { %1774 = vtanh.f32 %v347_v16  ;;  %496 = vperm.xlu0 %1693, %v2187_v7   ;;  %500 = vperm.xlu2 %1695, %v2179_v6  }
 0x146   :  { %v2297_v38 = vpop.f32.mrf.mxu2  ;;  %v2299_v39 = vpop.f32.mrf.mxu3 }
 0x147   :  { %v308_v40 = vpop.f32.mrf.mxu0  ;;  %v349_v41 = vpop.f32.mrf.mxu1  ;;  %v388_v5 = vadd.f32 %v2297_v38, %v2331_v63  ;;  %v426_v38 = vadd.f32 %v2295_v35, %v2322_v57 }
 0x148   :  { %v309_v0 = vadd.f32 %v308_v40, %v2309_v48  ;;  %v350_v1 = vadd.f32 %v349_v41, %v2309_v48  ;;  %v2351_v28 = vpop.eup %1772 }
 0x149   :  { %v2354_v33 = vpop.eup %1774 }
 0x14a   :  { %1776 = vtanh.f32 %v309_v0  ;;  %492 = vperm.xlu1 %1694, %v2192_v8   ;;  %v482_v8 = vld [vmem:[#allocation2 + $0x58] sm:$0xff] }
 0x14b   :  { %1778 = vtanh.f32 %v350_v1  ;;  %488 = vperm.xlu2 %1695, %v2200_v9   ;;  %v483_v9 = vld [vmem:[#allocation2 + $0x60] sm:$0xff] }
 0x14e   :  { %v2305_v44 = vpop.f32.mrf.mxu2  ;;  %v2307_v45 = vpop.f32.mrf.mxu3 }
 0x14f   :  { %v311_v46 = vpop.f32.mrf.mxu0  ;;  %v352_v47 = vpop.f32.mrf.mxu1 }
 0x150   :  { %v312_v29 = vadd.f32 %v311_v46, %v2311_v49  ;;  %v353_v36 = vadd.f32 %v352_v47, %v2311_v49  ;;  %v1777_v37 = vpop.eup %1776 }
 0x151   :  { %v1779_v40 = vpop.eup %1778 }
 0x156   :  { %v2315_v51 = vpop.f32.mrf.mxu2  ;;  %v2317_v52 = vpop.f32.mrf.mxu3 }
 0x157   :  { %v314_v53 = vpop.f32.mrf.mxu0  ;;  %v355_v54 = vpop.f32.mrf.mxu1  ;;  %v394_v62 = vadd.f32 %v2315_v51, %v2311_v49  ;;  %v432_v51 = vadd.f32 %v2307_v45, %v2309_v48  ;;  %v385_v45 = vadd.f32 %v2293_v34, %v2322_v57  ;;  %v423_v34 = vadd.f32 %v2291_v31, %v2319_v55  ;;  %v479_v31 = vld [vmem:[#allocation2 + $0x40] sm:$0xff] }
 0x158   :  { %v315_v25 = vadd.f32 %v314_v53, %v2301_v42  ;;  %v356_v27 = vadd.f32 %v355_v54, %v2301_v42 }
 0x15e   :  { %v2325_v59 = vpop.f32.mrf.mxu2  ;;  %v2327_v60 = vpop.f32.mrf.mxu3 }
 0x15f   :  { %v317_v61 = vpop.f32.mrf.mxu0  ;;  %v358_v14 = vpop.f32.mrf.mxu1  ;;  %v397_v2 = vadd.f32 %v2325_v59, %v2301_v42 }
 0x160   :  { %v318_v10 = vadd.f32 %v317_v61, %v2303_v43  ;;  %v359_v11 = vadd.f32 %v358_v14, %v2303_v43  ;;  %v438_v61 = vadd.f32 %v2327_v60, %v2301_v42  ;;  %v391_v42 = vadd.f32 %v2305_v44, %v2309_v48 }
 0x161   :  { %v429_v44 = vadd.f32 %v2299_v39, %v2331_v63  ;;  %v382_v39 = vadd.f32 %v2289_v30, %v2319_v55 }
 0x162   :  { %1780 = vtanh.f32 %v318_v10 }
 0x163   :  { %1782 = vtanh.f32 %v359_v11 }
 0x166   :  { %v399_v12 = vpop.f32.mrf.mxu2  ;;  %v440_v17 = vpop.f32.mrf.mxu3 }
 0x167   :  { %v320_v19 = vpop.f32.mrf.mxu0  ;;  %v361_v20 = vpop.f32.mrf.mxu1  ;;  %v400_v54 = vadd.f32 %v399_v12, %v2303_v43  ;;  %v441_v58 = vadd.f32 %v440_v17, %v2303_v43  ;;  %v435_v43 = vadd.f32 %v2317_v52, %v2311_v49  ;;  %v480_v12 = vld [vmem:[#allocation2 + $0x48] sm:$0xff]  ;;  %v481_v17 = vld [vmem:[#allocation2 + $0x50] sm:$0xff] }
 0x168   :  { %v321_v22 = vadd.f32 %v320_v19, %v2313_v50  ;;  %v362_v23 = vadd.f32 %v361_v20, %v2313_v50  ;;  %v1781_v53 = vpop.eup %1780  ;;  %v485_v19 = vld [vmem:[#allocation2 + $0x70] sm:$0xff]  ;;  %v486_v20 = vld [vmem:[#allocation2 + $0x78] sm:$0xff] }
 0x169   :  { %v1783_v3 = vpop.eup %1782 }
 0x16a   :  { %1784 = vtanh.f32 %v321_v22 }
 0x16b   :  { %1786 = vtanh.f32 %v362_v23 }
 0x16c   :  { %1788 = vtanh.f32 %v315_v25 }
 0x16d   :  { %1790 = vtanh.f32 %v356_v27 }
 0x16e   :  { %v402_v41 = vpop.f32.mrf.mxu2  ;;  %v443_v46 = vpop.f32.mrf.mxu3  ;;  %1792 = vtanh.f32 %v312_v29 }
 0x16f   :  { %v403_v47 = vadd.f32 %v402_v41, %v2313_v50  ;;  %v444_v56 = vadd.f32 %v443_v46, %v2313_v50  ;;  %1794 = vtanh.f32 %v353_v36 }
 0x170   :  { %v1785_v13 = vpop.eup %1784 }
 0x171   :  { %1796 = vtanh.f32 %v403_v47  ;;  %v1787_v4 = vpop.eup %1786  ;;  %551 = vmatpush.msrb.mxu0 %v1785_v13 }
 0x172   :  { %1798 = vtanh.f32 %v444_v56  ;;  %v1789_v14 = vpop.eup %1788  ;;  %592 = vmatpush.msrb.mxu1 %v1787_v4 }
 0x173   :  { %1800 = vtanh.f32 %v400_v54  ;;  %v1791_v50 = vpop.eup %1790  ;;  %552 = vmatpush.msrb.mxu0 %v1781_v53 }
 0x174   :  { %1802 = vtanh.f32 %v441_v58  ;;  %v1793_v59 = vpop.eup %1792  ;;  %593 = vmatpush.msrb.mxu1 %v1783_v3 }
 0x175   :  { %1804 = vtanh.f32 %v397_v2  ;;  %v1795_v60 = vpop.eup %1794  ;;  %553 = vmatpush.msrb.mxu0 %v1789_v14 }
 0x176   :  { %1806 = vtanh.f32 %v438_v61  ;;  %594 = vmatpush.msrb.mxu1 %v1791_v50 }
 0x177   :  { %v1797_v49 = vpop.eup %1796  ;;  %1808 = vtanh.f32 %v394_v62  ;;  %554 = vmatpush.msrb.mxu0 %v1793_v59 }
 0x178   :  { %v1799_v52 = vpop.eup %1798  ;;  %1810 = vtanh.f32 %v435_v43  ;;  %633 = vmatpush.msrb.mxu2 %v1797_v49  ;;  %595 = vmatpush.msrb.mxu1 %v1795_v60 }
 0x179   :  { %v1801_v7 = vpop.eup %1800  ;;  %1812 = vtanh.f32 %v391_v42  ;;  %674 = vmatpush.msrb.mxu3 %v1799_v52  ;;  %555 = vmatpush.msrb.mxu0 %v1777_v37 }
 0x17a   :  { %v1803_v6 = vpop.eup %1802  ;;  %1814 = vtanh.f32 %v432_v51  ;;  %634 = vmatpush.msrb.mxu2 %v1801_v7  ;;  %596 = vmatpush.msrb.mxu1 %v1779_v40 }
 0x17b   :  { %v1805_v48 = vpop.eup %1804  ;;  %1816 = vtanh.f32 %v388_v5  ;;  %675 = vmatpush.msrb.mxu3 %v1803_v6  ;;  %556 = vmatpush.msrb.mxu0 %v2351_v28 }
 0x17c   :  { %v1807_v63 = vpop.eup %1806  ;;  %1818 = vtanh.f32 %v429_v44  ;;  %635 = vmatpush.msrb.mxu2 %v1805_v48  ;;  %597 = vmatpush.msrb.mxu1 %v2354_v33 }
 0x17d   :  { %v1809_v15 = vpop.eup %1808  ;;  %1820 = vtanh.f32 %v385_v45  ;;  %676 = vmatpush.msrb.mxu3 %v1807_v63  ;;  %557 = vmatpush.msrb.mxu0 %v2345_v24 }
 0x17e   :  { %v1811_v35 = vpop.eup %1810  ;;  %1822 = vtanh.f32 %v426_v38  ;;  %636 = vmatpush.msrb.mxu2 %v1809_v15  ;;  %598 = vmatpush.msrb.mxu1 %v2348_v26 }
 0x17f   :  { %v1813_v30 = vpop.eup %1812  ;;  %1824 = vtanh.f32 %v382_v39  ;;  %677 = vmatpush.msrb.mxu3 %v1811_v35  ;;  %558 = vmatpush.msrb.mxu0 %v2339_v18  ;;  %v484_v18 = vld [vmem:[#allocation2 + $0x68] sm:$0xff] }
 0x180   :  { %v1815_v55 = vpop.eup %1814  ;;  %1826 = vtanh.f32 %v423_v34  ;;  %637 = vmatpush.msrb.mxu2 %v1813_v30  ;;  %599 = vmatpush.msrb.mxu1 %v2341_v21 }
 0x181   :  { %v1817_v57 = vpop.eup %1816  ;;  %678 = vmatpush.msrb.mxu3 %v1815_v55  ;;  %1538 = vmatmul.msk.f32.vlgmr.msrb.gmra.mxu0 %vm257_vm0, %v479_v31 }
 0x182   :  { %v1819_v16 = vpop.eup %1818  ;;  %1546 = vmatmul.msk.f32.vlgmr.msrb.gmra.mxu1 %vm257_vm0, %v479_v31  ;;  %638 = vmatpush.msrb.mxu2 %v1817_v57 }
 0x183   :  { %v1821_v0 = vpop.eup %1820  ;;  %679 = vmatpush.msrb.mxu3 %v1819_v16 }
 0x184   :  { %v1823_v1 = vpop.eup %1822  ;;  %639 = vmatpush.msrb.mxu2 %v1821_v0 }
 0x185   :  { %v1825_v10 = vpop.eup %1824  ;;  %680 = vmatpush.msrb.mxu3 %v1823_v1 }
 0x186   :  { %v1827_v11 = vpop.eup %1826  ;;  %640 = vmatpush.msrb.mxu2 %v1825_v10 }
 0x187   :  { %681 = vmatpush.msrb.mxu3 %v1827_v11  ;;  %1554 = vmatmul.msk.f32.vlgmr.msrb.gmra.mxu2 %vm257_vm0, %v479_v31 }
 0x188   :  { %1562 = vmatmul.msk.f32.vlgmr.msrb.gmra.mxu3 %vm257_vm0, %v479_v31 }
 0x189   :  { %1539 = vmatmul.msk.f32.gmra.mxu0 %vm257_vm0, %v480_v12 }
 0x18a   :  { %1547 = vmatmul.msk.f32.gmra.mxu1 %vm257_vm0, %v480_v12 }
 0x18f   :  { %1555 = vmatmul.msk.f32.gmra.mxu2 %vm257_vm0, %v480_v12 }
 0x190   :  { %1563 = vmatmul.msk.f32.gmra.mxu3 %vm257_vm0, %v480_v12 }
 0x191   :  { %1540 = vmatmul.msk.f32.gmra.mxu0 %vm257_vm0, %v481_v17 }
 0x192   :  { %1548 = vmatmul.msk.f32.gmra.mxu1 %vm257_vm0, %v481_v17 }
 0x195   :  { %v2445_v41 = vpop.permute.xlu2 %508 }
 0x197   :  { %1556 = vmatmul.msk.f32.gmra.mxu2 %vm257_vm0, %v481_v17 }
 0x198   :  { %1564 = vmatmul.msk.f32.gmra.mxu3 %vm257_vm0, %v481_v17 }
 0x199   :  { %1541 = vmatmul.msk.f32.gmra.mxu0 %vm257_vm0, %v482_v8 }
 0x19a   :  { %1549 = vmatmul.msk.f32.gmra.mxu1 %vm257_vm0, %v482_v8 }
 0x19d   :  { %v2453_v3 = vpop.permute.xlu2 %500 }
 0x19f   :  { %1557 = vmatmul.msk.f32.gmra.mxu2 %vm257_vm0, %v482_v8 }
 0x1a0   :  { %1565 = vmatmul.msk.f32.gmra.mxu3 %vm257_vm0, %v482_v8 }
 0x1a1   :  { %1542 = vmatmul.msk.f32.gmra.mxu0 %vm257_vm0, %v483_v9 }
 0x1a2   :  { %1550 = vmatmul.msk.f32.gmra.mxu1 %vm257_vm0, %v483_v9 }
 0x1a5   :  { %v2461_v50 = vpop.permute.xlu2 %488 }
 0x1a7   :  { %1558 = vmatmul.msk.f32.gmra.mxu2 %vm257_vm0, %v483_v9 }
 0x1a8   :  { %1566 = vmatmul.msk.f32.gmra.mxu3 %vm257_vm0, %v483_v9 }
 0x1a9   :  { %1543 = vmatmul.msk.f32.gmra.mxu0 %vm257_vm0, %v484_v18 }
 0x1aa   :  { %1551 = vmatmul.msk.f32.gmra.mxu1 %vm257_vm0, %v484_v18 }
 0x1ac   :  { %v2451_v56 = vpop.permute.xlu1 %512 }
 0x1ad   :  { %v517_v49 = vpop.permute.xlu0 %516 }
 0x1af   :  { %1559 = vmatmul.msk.f32.gmra.mxu2 %vm257_vm0, %v484_v18 }
 0x1b0   :  { %1567 = vmatmul.msk.f32.gmra.mxu3 %vm257_vm0, %v484_v18  ;;  %v2125_v18 = vmov 4  }
 0x1b1   :  { %1544 = vmatmul.msk.f32.gmra.mxu0 %vm257_vm0, %v485_v19  ;;  %1697 = vset.pattern.permute.xlu1 %v2125_v18 }
 0x1b2   :  { %1552 = vmatmul.msk.f32.gmra.mxu1 %vm257_vm0, %v485_v19  ;;  %1696 = vset.pattern.permute.xlu0 %v2125_v18 }
 0x1b3   :  { %1698 = vset.pattern.permute.xlu2 %v2125_v18 }
 0x1b4   :  { %v2459_v62 = vpop.permute.xlu1 %504 }
 0x1b5   :  { %v2485_v10 = vpop.permute.xlu0 %496 }
 0x1b7   :  { %1560 = vmatmul.msk.f32.gmra.mxu2 %vm257_vm0, %v485_v19 }
 0x1b8   :  { %1568 = vmatmul.msk.f32.gmra.mxu3 %vm257_vm0, %v485_v19 }
 0x1b9   :  { %1545 = vmatmul.msk.f32.gmra.mxu0 %vm257_vm0, %v486_v20 }
 0x1ba   :  { %1553 = vmatmul.msk.f32.gmra.mxu1 %vm257_vm0, %v486_v20 }
 0x1bc   :  { %v2473_v48 = vpop.permute.xlu1 %492 }
 0x1bf   :  { %1561 = vmatmul.msk.f32.gmra.mxu2 %vm257_vm0, %v486_v20 }
 0x1c0   :  { %1569 = vmatmul.msk.f32.gmra.mxu3 %vm257_vm0, %v486_v20 }
 0x1fe   :  { %v560_v21 = vpop.f32.mrf.mxu0 }
 0x1ff   :  { %v601_v22 = vpop.f32.mrf.mxu1  ;;  %v561_v43 = vadd.f32 %v560_v21, %v2461_v50 }
 0x200   :  { %v602_v59 = vadd.f32 %v601_v22, %v2461_v50  ;;  %v2084_v22 = vld [vmem:[%s2987_s1 + $0x30] sm:$0xff] }
 0x201   :  { %1828 = vtanh.f32 %v561_v43  ;;  %773 = vperm.xlu1 %1697, %v2084_v22  }
 0x202   :  { %1830 = vtanh.f32 %v602_v59 }
 0x206   :  { %v563_v23 = vpop.f32.mrf.mxu0 }
 0x207   :  { %v604_v24 = vpop.f32.mrf.mxu1  ;;  %v2477_v35 = vpop.eup %1828  ;;  %v564_v30 = vadd.f32 %v563_v23, %v2473_v48 }
 0x208   :  { %v2480_v31 = vpop.eup %1830  ;;  %v605_v55 = vadd.f32 %v604_v24, %v2473_v48 }
 0x20a   :  { %v2431_v25 = vpop.f32.mrf.mxu2 }
 0x20b   :  { %v2433_v26 = vpop.f32.mrf.mxu3 }
 0x20e   :  { %v566_v27 = vpop.f32.mrf.mxu0 }
 0x20f   :  { %v2435_v28 = vpop.f32.mrf.mxu1  ;;  %v567_v12 = vadd.f32 %v566_v27, %v2485_v10 }
 0x210   :  { %v608_v8 = vadd.f32 %v2435_v28, %v2485_v10 }
 0x212   :  { %v2437_v29 = vpop.f32.mrf.mxu2 }
 0x213   :  { %v2439_v32 = vpop.f32.mrf.mxu3 }
 0x216   :  { %v569_v33 = vpop.f32.mrf.mxu0 }
 0x217   :  { %v610_v36 = vpop.f32.mrf.mxu1  ;;  %v570_v16 = vadd.f32 %v569_v33, %v2453_v3 }
 0x218   :  { %v611_v1 = vadd.f32 %v610_v36, %v2453_v3 }
 0x21a   :  { %v2441_v37 = vpop.f32.mrf.mxu2 }
 0x21b   :  { %v2443_v40 = vpop.f32.mrf.mxu3 }
 0x21e   :  { %v572_v46 = vpop.f32.mrf.mxu0 }
 0x21f   :  { %v613_v53 = vpop.f32.mrf.mxu1  ;;  %v573_v39 = vadd.f32 %v572_v46, %v2459_v62 }
 0x220   :  { %v614_v63 = vadd.f32 %v613_v53, %v2459_v62 }
 0x222   :  { %v2447_v54 = vpop.f32.mrf.mxu2 }
 0x223   :  { %v2449_v47 = vpop.f32.mrf.mxu3 }
 0x226   :  { %v575_v58 = vpop.f32.mrf.mxu0 }
 0x227   :  { %v616_v13 = vpop.f32.mrf.mxu1  ;;  %v576_v7 = vadd.f32 %v575_v58, %v2445_v41  ;;  %v2085_v58 = vld [vmem:[%s2987_s1 + $0x38] sm:$0xff] }
 0x228   :  { %v617_v38 = vadd.f32 %v616_v13, %v2445_v41  ;;  %777 = vperm.xlu0 %1696, %v2085_v58  }
 0x22a   :  { %v2455_v2 = vpop.f32.mrf.mxu2 }
 0x22b   :  { %v2457_v4 = vpop.f32.mrf.mxu3  ;;  %v655_v43 = vadd.f32 %v2455_v2, %v2459_v62  ;;  %v2087_v2 = vld [vmem:[%s2987_s1 + $0x20] sm:$0xff] }
 0x22c   :  { %765 = vperm.xlu1 %1697, %v2087_v2  }
 0x22e   :  { %v578_v61 = vpop.f32.mrf.mxu0 }
 0x22f   :  { %v619_v14 = vpop.f32.mrf.mxu1  ;;  %v579_v51 = vadd.f32 %v578_v61, %v2451_v56 }
 0x230   :  { %v620_v5 = vadd.f32 %v619_v14, %v2451_v56 }
 0x231   :  { %1832 = vtanh.f32 %v579_v51 }
 0x232   :  { %v2465_v42 = vpop.f32.mrf.mxu2  ;;  %1834 = vtanh.f32 %v620_v5  ;;  %v690_v5 = vadd.f32 %v2443_v40, %v2485_v10 }
 0x233   :  { %v2467_v60 = vpop.f32.mrf.mxu3  ;;  %v658_v53 = vadd.f32 %v2465_v42, %v2445_v41  ;;  %v696_v42 = vadd.f32 %v2457_v4, %v2459_v62  ;;  %v649_v62 = vadd.f32 %v2441_v37, %v2485_v10  ;;  %v687_v37 = vadd.f32 %v2439_v32, %v2473_v48  ;;  %v2598_v10 = vld [vmem:[#allocation2 + $0xb0] sm:$0xff] }
 0x234   :  { %v699_v61 = vadd.f32 %v2467_v60, %v2445_v41  ;;  %v652_v60 = vadd.f32 %v2447_v54, %v2453_v3 }
 0x236   :  { %v581_v52 = vpop.f32.mrf.mxu0 }
 0x237   :  { %v622_v44 = vpop.f32.mrf.mxu1  ;;  %v582_v45 = vadd.f32 %v581_v52, %v517_v49  ;;  %v1833_v57 = vpop.eup %1832  ;;  %v2522_v52 = vld [vmem:[#allocation2 + $0x80] sm:$0xff] }
 0x238   :  { %v623_v6 = vadd.f32 %v622_v44, %v517_v49  ;;  %v1835_v0 = vpop.eup %1834 }
 0x239   :  { %1836 = vtanh.f32 %v582_v45  ;;  %v684_v45 = vadd.f32 %v2433_v26, %v2461_v50  ;;  %v2089_v26 = vld [vmem:[%s2987_s1 + $0x10] sm:$0xff] }
 0x23a   :  { %1838 = vtanh.f32 %v623_v6  ;;  %v660_v34 = vpop.f32.mrf.mxu2  ;;  %v2088_v6 = vld [vmem:[%s2987_s1 + $0x8] sm:$0xff]  ;;  %757 = vperm.xlu0 %1696, %v2089_v26  }
 0x23b   :  { %v701_v15 = vpop.f32.mrf.mxu3  ;;  %1840 = vtanh.f32 %v576_v7  ;;  %v661_v24 = vadd.f32 %v660_v34, %v2451_v56  ;;  %v643_v7 = vadd.f32 %v2431_v25, %v2461_v50  ;;  %753 = vperm.xlu1 %1697, %v2088_v6  }
 0x23c   :  { %1842 = vtanh.f32 %v617_v38  ;;  %v702_v36 = vadd.f32 %v701_v15, %v2451_v56  ;;  %v2086_v56 = vld [vmem:[%s2987_s1 + $0x28] sm:$0xff] }
 0x23d   :  { %1844 = vtanh.f32 %v573_v39  ;;  %769 = vperm.xlu2 %1698, %v2086_v56  }
 0x23e   :  { %1846 = vtanh.f32 %v614_v63  ;;  %v2545_v63 = vld [vmem:[#allocation2 + $0x88] sm:$0xff] }
 0x23f   :  { %v1837_v11 = vpop.eup %1836  ;;  %1848 = vtanh.f32 %v564_v30 }
 0x240   :  { %v1839_v17 = vpop.eup %1838  ;;  %1850 = vtanh.f32 %v605_v55  ;;  %812 = vmatpush.msra.mxu0 %v1837_v11  ;;  %v2555_v55 = vld [vmem:[#allocation2 + $0x90] sm:$0xff]  ;;  %v2608_v11 = vld [vmem:[#allocation2 + $0xb8] sm:$0xff] }
 0x241   :  { %v1841_v9 = vpop.eup %1840  ;;  %1852 = vtanh.f32 %v570_v16  ;;  %853 = vmatpush.msra.mxu1 %v1839_v17  ;;  %v2568_v16 = vld [vmem:[#allocation2 + $0x98] sm:$0xff] }
 0x242   :  { %v1843_v19 = vpop.eup %1842  ;;  %1854 = vtanh.f32 %v611_v1  ;;  %v663_v20 = vpop.f32.mrf.mxu2  ;;  %813 = vmatpush.msra.mxu0 %v1833_v57  ;;  %v2091_v57 = vld [vmem:[%s2987_s1] sm:$0xff]  ;;  %v2588_v1 = vld [vmem:[#allocation2 + $0xa8] sm:$0xff] }
 0x243   :  { %v704_v21 = vpop.f32.mrf.mxu3  ;;  %v1845_v23 = vpop.eup %1844  ;;  %1856 = vtanh.f32 %v567_v12  ;;  %v664_v27 = vadd.f32 %v663_v20, %v517_v49  ;;  %854 = vmatpush.msra.mxu1 %v1835_v0  ;;  %v2578_v0 = vld [vmem:[#allocation2 + $0xa0] sm:$0xff] }
 0x244   :  { %v705_v28 = vadd.f32 %v704_v21, %v517_v49  ;;  %v1847_v33 = vpop.eup %1846  ;;  %1858 = vtanh.f32 %v608_v8  ;;  %814 = vmatpush.msra.mxu0 %v1841_v9  ;;  %v693_v49 = vadd.f32 %v2449_v47, %v2453_v3  ;;  %v646_v3 = vadd.f32 %v2437_v29, %v2473_v48  ;;  %v2090_v48 = vld [vmem:[%s2987_s1 + $0x18] sm:$0xff] }
 0x245   :  { %v1849_v46 = vpop.eup %1848  ;;  %1860 = vtanh.f32 %v664_v27  ;;  %855 = vmatpush.msra.mxu1 %v1843_v19  ;;  %761 = vperm.xlu2 %1698, %v2090_v48  }
 0x246   :  { %v1851_v13 = vpop.eup %1850  ;;  %1862 = vtanh.f32 %v705_v28  ;;  %815 = vmatpush.msra.mxu0 %v1845_v23 }
 0x247   :  { %v1853_v14 = vpop.eup %1852  ;;  %1864 = vtanh.f32 %v661_v24  ;;  %856 = vmatpush.msra.mxu1 %v1847_v33 }
 0x248   :  { %v1855_v59 = vpop.eup %1854  ;;  %1866 = vtanh.f32 %v702_v36  ;;  %816 = vmatpush.msra.mxu0 %v1853_v14 }
 0x249   :  { %v1857_v41 = vpop.eup %1856  ;;  %1868 = vtanh.f32 %v658_v53  ;;  %857 = vmatpush.msra.mxu1 %v1855_v59 }
 0x24a   :  { %v1859_v51 = vpop.eup %1858  ;;  %1870 = vtanh.f32 %v699_v61  ;;  %817 = vmatpush.msra.mxu0 %v1857_v41 }
 0x24b   :  { %v1861_v4 = vpop.eup %1860  ;;  %1872 = vtanh.f32 %v655_v43  ;;  %858 = vmatpush.msra.mxu1 %v1859_v51 }
 0x24c   :  { %v1863_v54 = vpop.eup %1862  ;;  %1874 = vtanh.f32 %v696_v42  ;;  %818 = vmatpush.msra.mxu0 %v1849_v46  ;;  %894 = vmatpush.msra.mxu2 %v1861_v4 }
 0x24d   :  { %v1865_v47 = vpop.eup %1864  ;;  %1876 = vtanh.f32 %v652_v60  ;;  %859 = vmatpush.msra.mxu1 %v1851_v13  ;;  %935 = vmatpush.msra.mxu3 %v1863_v54 }
 0x24e   :  { %v1867_v44 = vpop.eup %1866  ;;  %1878 = vtanh.f32 %v693_v49  ;;  %819 = vmatpush.msra.mxu0 %v2477_v35  ;;  %895 = vmatpush.msra.mxu2 %v1865_v47 }
 0x24f   :  { %v1869_v40 = vpop.eup %1868  ;;  %1880 = vtanh.f32 %v649_v62  ;;  %860 = vmatpush.msra.mxu1 %v2480_v31  ;;  %936 = vmatpush.msra.mxu3 %v1867_v44 }
 0x250   :  { %v1871_v29 = vpop.eup %1870  ;;  %1882 = vtanh.f32 %v690_v5  ;;  %1570 = vmatmul.msk.f32.vlgmr.msra.gmra.mxu0 %vm257_vm0, %v2522_v52  ;;  %1578 = vmatmul.msk.f32.vlgmr.msra.gmra.mxu1 %vm257_vm0, %v2522_v52 }
 0x251   :  { %v1873_v32 = vpop.eup %1872  ;;  %1884 = vtanh.f32 %v646_v3  ;;  %896 = vmatpush.msra.mxu2 %v1869_v40  ;;  %937 = vmatpush.msra.mxu3 %v1871_v29 }
 0x252   :  { %v1875_v25 = vpop.eup %1874  ;;  %1886 = vtanh.f32 %v687_v37  ;;  %749 = vperm.xlu2 %1698, %v2091_v57  }
 0x253   :  { %v1877_v50 = vpop.eup %1876  ;;  %1888 = vtanh.f32 %v643_v7  ;;  %897 = vmatpush.msra.mxu2 %v1873_v32  ;;  %938 = vmatpush.msra.mxu3 %v1875_v25 }
 0x254   :  { %v1879_v38 = vpop.eup %1878  ;;  %1890 = vtanh.f32 %v684_v45 }
 0x255   :  { %v1881_v39 = vpop.eup %1880  ;;  %898 = vmatpush.msra.mxu2 %v1877_v50  ;;  %939 = vmatpush.msra.mxu3 %v1879_v38 }
 0x256   :  { %v1883_v34 = vpop.eup %1882 }
 0x257   :  { %v1885_v15 = vpop.eup %1884  ;;  %899 = vmatpush.msra.mxu2 %v1881_v39  ;;  %940 = vmatpush.msra.mxu3 %v1883_v34 }
 0x258   :  { %v1887_v35 = vpop.eup %1886  ;;  %1571 = vmatmul.msk.f32.gmra.mxu0 %vm257_vm0, %v2545_v63  ;;  %1579 = vmatmul.msk.f32.gmra.mxu1 %vm257_vm0, %v2545_v63 }
 0x259   :  { %v1889_v30 = vpop.eup %1888  ;;  %900 = vmatpush.msra.mxu2 %v1885_v15  ;;  %941 = vmatpush.msra.mxu3 %v1887_v35 }
 0x25a   :  { %v1891_v31 = vpop.eup %1890 }
 0x25b   :  { %901 = vmatpush.msra.mxu2 %v1889_v30  ;;  %942 = vmatpush.msra.mxu3 %v1891_v31 }
 0x25c   :  { %1586 = vmatmul.msk.f32.vlgmr.msra.gmra.mxu2 %vm257_vm0, %v2522_v52  ;;  %1594 = vmatmul.msk.f32.vlgmr.msra.gmra.mxu3 %vm257_vm0, %v2522_v52 }
 0x260   :  { %1572 = vmatmul.msk.f32.gmra.mxu0 %vm257_vm0, %v2555_v55  ;;  %1580 = vmatmul.msk.f32.gmra.mxu1 %vm257_vm0, %v2555_v55 }
 0x264   :  { %1587 = vmatmul.msk.f32.gmra.mxu2 %vm257_vm0, %v2545_v63  ;;  %1595 = vmatmul.msk.f32.gmra.mxu3 %vm257_vm0, %v2545_v63 }
 0x268   :  { %1573 = vmatmul.msk.f32.gmra.mxu0 %vm257_vm0, %v2568_v16  ;;  %1581 = vmatmul.msk.f32.gmra.mxu1 %vm257_vm0, %v2568_v16 }
 0x26c   :  { %1588 = vmatmul.msk.f32.gmra.mxu2 %vm257_vm0, %v2555_v55  ;;  %1596 = vmatmul.msk.f32.gmra.mxu3 %vm257_vm0, %v2555_v55 }
 0x270   :  { %1574 = vmatmul.msk.f32.gmra.mxu0 %vm257_vm0, %v2578_v0  ;;  %1582 = vmatmul.msk.f32.gmra.mxu1 %vm257_vm0, %v2578_v0 }
 0x273   :  { %v2646_v56 = vpop.permute.xlu1 %773 }
 0x274   :  { %1589 = vmatmul.msk.f32.gmra.mxu2 %vm257_vm0, %v2568_v16  ;;  %1597 = vmatmul.msk.f32.gmra.mxu3 %vm257_vm0, %v2568_v16 }
 0x278   :  { %1575 = vmatmul.msk.f32.gmra.mxu0 %vm257_vm0, %v2588_v1  ;;  %1583 = vmatmul.msk.f32.gmra.mxu1 %vm257_vm0, %v2588_v1 }
 0x27c   :  { %1590 = vmatmul.msk.f32.gmra.mxu2 %vm257_vm0, %v2578_v0  ;;  %1598 = vmatmul.msk.f32.gmra.mxu3 %vm257_vm0, %v2578_v0 }
 0x280   :  { %1576 = vmatmul.msk.f32.gmra.mxu0 %vm257_vm0, %v2598_v10  ;;  %1584 = vmatmul.msk.f32.gmra.mxu1 %vm257_vm0, %v2598_v10 }
 0x284   :  { %1591 = vmatmul.msk.f32.gmra.mxu2 %vm257_vm0, %v2588_v1  ;;  %1599 = vmatmul.msk.f32.gmra.mxu3 %vm257_vm0, %v2588_v1 }
 0x288   :  { %1577 = vmatmul.msk.f32.gmra.mxu0 %vm257_vm0, %v2608_v11  ;;  %1585 = vmatmul.msk.f32.gmra.mxu1 %vm257_vm0, %v2608_v11 }
 0x28c   :  { %1592 = vmatmul.msk.f32.gmra.mxu2 %vm257_vm0, %v2598_v10  ;;  %1600 = vmatmul.msk.f32.gmra.mxu3 %vm257_vm0, %v2598_v10 }
 0x294   :  { %1593 = vmatmul.msk.f32.gmra.mxu2 %vm257_vm0, %v2608_v11  ;;  %1601 = vmatmul.msk.f32.gmra.mxu3 %vm257_vm0, %v2608_v11 }
 0x297   :  { %v2648_v14 = vpop.permute.xlu2 %769 }
 0x29a   :  { %v2655_v51 = vpop.permute.xlu0 %777 }
 0x29e   :  { %v2658_v2 = vpop.permute.xlu1 %765 }
 0x29f   :  { %v2660_v54 = vpop.permute.xlu2 %761 }
 0x2ac   :  { %v2672_v26 = vpop.permute.xlu0 %757 }
 0x2ad   :  { %v2674_v38 = vpop.permute.xlu1 %753 }
 0x2cd   :  { %v2622_v12 = vpop.f32.mrf.mxu0  ;;  %v2624_v17 = vpop.f32.mrf.mxu1 }
 0x2d5   :  { %v2626_v8 = vpop.f32.mrf.mxu0  ;;  %v2628_v9 = vpop.f32.mrf.mxu1 }
 0x2d6   :  { %v825_v31 = vadd.f32 %v2626_v8, %v2674_v38 }
 0x2dd   :  { %v827_v18 = vpop.f32.mrf.mxu0  ;;  %v868_v19 = vpop.f32.mrf.mxu1 }
 0x2de   :  { %v828_v48 = vadd.f32 %v827_v18, %v2672_v26  ;;  %v869_v35 = vadd.f32 %v868_v19, %v2672_v26  ;;  %v866_v18 = vadd.f32 %v2628_v9, %v2674_v38 }
 0x2df   :  { %v2630_v20 = vpop.f32.mrf.mxu2  ;;  %v2632_v21 = vpop.f32.mrf.mxu3 }
 0x2e5   :  { %v830_v22 = vpop.f32.mrf.mxu0  ;;  %v871_v23 = vpop.f32.mrf.mxu1 }
 0x2e6   :  { %v831_v32 = vadd.f32 %v830_v22, %v2660_v54  ;;  %v872_v6 = vadd.f32 %v871_v23, %v2660_v54  ;;  %v2680_v22 = vpop.permute.xlu2 %749 }
 0x2e7   :  { %v2634_v24 = vpop.f32.mrf.mxu2  ;;  %v2636_v27 = vpop.f32.mrf.mxu3  ;;  %v822_v19 = vadd.f32 %v2622_v12, %v2680_v22  ;;  %v863_v8 = vadd.f32 %v2624_v17, %v2680_v22 }
 0x2ed   :  { %v833_v28 = vpop.f32.mrf.mxu0  ;;  %v874_v33 = vpop.f32.mrf.mxu1 }
 0x2ee   :  { %v834_v7 = vadd.f32 %v833_v28, %v2658_v2  ;;  %v875_v29 = vadd.f32 %v874_v33, %v2658_v2 }
 0x2ef   :  { %v2638_v36 = vpop.f32.mrf.mxu2  ;;  %v2640_v46 = vpop.f32.mrf.mxu3 }
 0x2f5   :  { %v836_v53 = vpop.f32.mrf.mxu0  ;;  %v877_v58 = vpop.f32.mrf.mxu1 }
 0x2f6   :  { %v837_v5 = vadd.f32 %v836_v53, %v2648_v14  ;;  %v878_v44 = vadd.f32 %v877_v58, %v2648_v14 }
 0x2f7   :  { %v2642_v13 = vpop.f32.mrf.mxu2  ;;  %v2644_v61 = vpop.f32.mrf.mxu3 }
 0x2fd   :  { %v839_v43 = vpop.f32.mrf.mxu0  ;;  %v880_v59 = vpop.f32.mrf.mxu1 }
 0x2fe   :  { %v840_v60 = vadd.f32 %v839_v43, %v2646_v56  ;;  %v881_v49 = vadd.f32 %v880_v59, %v2646_v56 }
 0x2ff   :  { %v2650_v42 = vpop.f32.mrf.mxu2  ;;  %v2652_v41 = vpop.f32.mrf.mxu3 }
 0x300   :  { %1892 = vtanh.f32 %v840_v60 }
 0x301   :  { %1894 = vtanh.f32 %v881_v49 }
 0x305   :  { %v842_v4 = vpop.f32.mrf.mxu0  ;;  %v883_v62 = vpop.f32.mrf.mxu1 }
 0x306   :  { %v843_v47 = vadd.f32 %v842_v4, %v2655_v51  ;;  %v884_v3 = vadd.f32 %v883_v62, %v2655_v51  ;;  %v1893_v45 = vpop.eup %1892 }
 0x307   :  { %v918_v37 = vpop.f32.mrf.mxu2  ;;  %v2666_v40 = vpop.f32.mrf.mxu3 }
 0x308   :  { %1896 = vtanh.f32 %v843_v47  ;;  %v1895_v25 = vpop.eup %1894  ;;  %v919_v62 = vadd.f32 %v918_v37, %v2648_v14  ;;  %v960_v47 = vadd.f32 %v2666_v40, %v2648_v14  ;;  %v913_v37 = vadd.f32 %v2642_v13, %v2660_v54 }
 0x309   :  { %1898 = vtanh.f32 %v884_v3  ;;  %v954_v40 = vadd.f32 %v2644_v61, %v2660_v54  ;;  %v951_v13 = vadd.f32 %v2640_v46, %v2672_v26  ;;  %v904_v46 = vadd.f32 %v2630_v20, %v2680_v22 }
 0x30a   :  { %1900 = vtanh.f32 %v837_v5 }
 0x30b   :  { %1902 = vtanh.f32 %v878_v44  ;;  %v916_v44 = vadd.f32 %v2650_v42, %v2658_v2 }
 0x30c   :  { %1904 = vtanh.f32 %v834_v7 }
 0x30d   :  { %1906 = vtanh.f32 %v875_v29  ;;  %v957_v29 = vadd.f32 %v2652_v41, %v2658_v2  ;;  %v910_v41 = vadd.f32 %v2638_v36, %v2672_v26 }
 0x30e   :  { %v1897_v50 = vpop.eup %1896  ;;  %1908 = vtanh.f32 %v831_v32 }
 0x30f   :  { %v1899_v39 = vpop.eup %1898  ;;  %v921_v34 = vpop.f32.mrf.mxu2  ;;  %1008 = vmatpush.msrb.mxu0 %v1897_v50  ;;  %1910 = vtanh.f32 %v872_v6  ;;  %v948_v6 = vadd.f32 %v2636_v27, %v2674_v38 }
 0x310   :  { %v962_v15 = vpop.f32.mrf.mxu3  ;;  %v1901_v30 = vpop.eup %1900  ;;  %1049 = vmatpush.msrb.mxu1 %v1899_v39  ;;  %1912 = vtanh.f32 %v828_v48  ;;  %v922_v12 = vadd.f32 %v921_v34, %v2646_v56 }
 0x311   :  { %v1903_v57 = vpop.eup %1902  ;;  %1009 = vmatpush.msrb.mxu0 %v1893_v45  ;;  %1914 = vtanh.f32 %v869_v35  ;;  %v963_v49 = vadd.f32 %v962_v15, %v2646_v56 }
 0x312   :  { %v1905_v23 = vpop.eup %1904  ;;  %1050 = vmatpush.msrb.mxu1 %v1895_v25  ;;  %1916 = vtanh.f32 %v825_v31  ;;  %v907_v25 = vadd.f32 %v2634_v24, %v2674_v38  ;;  %v945_v24 = vadd.f32 %v2632_v21, %v2680_v22 }
 0x313   :  { %v1907_v28 = vpop.eup %1906  ;;  %1010 = vmatpush.msrb.mxu0 %v1901_v30  ;;  %1918 = vtanh.f32 %v866_v18 }
 0x314   :  { %1051 = vmatpush.msrb.mxu1 %v1903_v57  ;;  %v1909_v33 = vpop.eup %1908  ;;  %1920 = vtanh.f32 %v822_v19 }
 0x315   :  { %1011 = vmatpush.msrb.mxu0 %v1905_v23  ;;  %v1911_v9 = vpop.eup %1910  ;;  %1922 = vtanh.f32 %v863_v8 }
 0x316   :  { %1052 = vmatpush.msrb.mxu1 %v1907_v28  ;;  %v1913_v43 = vpop.eup %1912 }
 0x317   :  { %v924_v53 = vpop.f32.mrf.mxu2  ;;  %1012 = vmatpush.msrb.mxu0 %v1909_v33  ;;  %v1915_v17 = vpop.eup %1914 }
 0x318   :  { %v965_v58 = vpop.f32.mrf.mxu3  ;;  %v925_v59 = vadd.f32 %v924_v53, %v2655_v51  ;;  %1053 = vmatpush.msrb.mxu1 %v1911_v9  ;;  %v1917_v4 = vpop.eup %1916 }
 0x319   :  { %v966_v60 = vadd.f32 %v965_v58, %v2655_v51  ;;  %1013 = vmatpush.msrb.mxu0 %v1913_v43  ;;  %v1919_v5 = vpop.eup %1918 }
 0x31a   :  { %1924 = vtanh.f32 %v925_v59  ;;  %1054 = vmatpush.msrb.mxu1 %v1915_v17  ;;  %v1921_v3 = vpop.eup %1920 }
 0x31b   :  { %1926 = vtanh.f32 %v966_v60  ;;  %1014 = vmatpush.msrb.mxu0 %v1917_v4  ;;  %v1923_v7 = vpop.eup %1922 }
 0x31c   :  { %1928 = vtanh.f32 %v922_v12  ;;  %1055 = vmatpush.msrb.mxu1 %v1919_v5 }
 0x31d   :  { %1930 = vtanh.f32 %v963_v49  ;;  %1015 = vmatpush.msrb.mxu0 %v1921_v3 }
 0x31e   :  { %1932 = vtanh.f32 %v919_v62  ;;  %1056 = vmatpush.msrb.mxu1 %v1923_v7  ;;  %1602 = vmatmul.msk.f32.vlgmr.msrb.gmra.mxu0 %vm257_vm0, %v2522_v52 }
 0x31f   :  { %1934 = vtanh.f32 %v960_v47  ;;  %1610 = vmatmul.msk.f32.vlgmr.msrb.gmra.mxu1 %vm257_vm0, %v2522_v52 }
 0x320   :  { %v1925_v42 = vpop.eup %1924  ;;  %1936 = vtanh.f32 %v916_v44 }
 0x321   :  { %v1927_v45 = vpop.eup %1926  ;;  %1938 = vtanh.f32 %v957_v29  ;;  %1090 = vmatpush.msrb.mxu2 %v1925_v42 }
 0x322   :  { %v1929_v32 = vpop.eup %1928  ;;  %1940 = vtanh.f32 %v913_v37  ;;  %1131 = vmatpush.msrb.mxu3 %v1927_v45 }
 0x323   :  { %v1931_v61 = vpop.eup %1930  ;;  %1942 = vtanh.f32 %v954_v40  ;;  %1091 = vmatpush.msrb.mxu2 %v1929_v32 }
 0x324   :  { %v1933_v36 = vpop.eup %1932  ;;  %1944 = vtanh.f32 %v910_v41  ;;  %1132 = vmatpush.msrb.mxu3 %v1931_v61 }
 0x325   :  { %v1935_v50 = vpop.eup %1934  ;;  %1946 = vtanh.f32 %v951_v13  ;;  %1092 = vmatpush.msrb.mxu2 %v1933_v36 }
 0x326   :  { %v1937_v48 = vpop.eup %1936  ;;  %1948 = vtanh.f32 %v907_v25  ;;  %1133 = vmatpush.msrb.mxu3 %v1935_v50  ;;  %1603 = vmatmul.msk.f32.gmra.mxu0 %vm257_vm0, %v2545_v63 }
 0x327   :  { %v1939_v27 = vpop.eup %1938  ;;  %1950 = vtanh.f32 %v948_v6  ;;  %1611 = vmatmul.msk.f32.gmra.mxu1 %vm257_vm0, %v2545_v63  ;;  %1093 = vmatpush.msrb.mxu2 %v1937_v48 }
 0x328   :  { %v1941_v39 = vpop.eup %1940  ;;  %1134 = vmatpush.msrb.mxu3 %v1939_v27  ;;  %1952 = vtanh.f32 %v904_v46 }
 0x329   :  { %v1943_v20 = vpop.eup %1942  ;;  %1094 = vmatpush.msrb.mxu2 %v1941_v39  ;;  %1954 = vtanh.f32 %v945_v24 }
 0x32a   :  { %v1945_v34 = vpop.eup %1944  ;;  %1135 = vmatpush.msrb.mxu3 %v1943_v20 }
 0x32b   :  { %v1947_v21 = vpop.eup %1946  ;;  %1095 = vmatpush.msrb.mxu2 %v1945_v34 }
 0x32c   :  { %v1949_v15 = vpop.eup %1948  ;;  %1136 = vmatpush.msrb.mxu3 %v1947_v21 }
 0x32d   :  { %v1951_v35 = vpop.eup %1950  ;;  %1096 = vmatpush.msrb.mxu2 %v1949_v15 }
 0x32e   :  { %v1953_v30 = vpop.eup %1952  ;;  %1137 = vmatpush.msrb.mxu3 %v1951_v35  ;;  %1604 = vmatmul.msk.f32.gmra.mxu0 %vm257_vm0, %v2555_v55 }
 0x32f   :  { %v1955_v31 = vpop.eup %1954  ;;  %1612 = vmatmul.msk.f32.gmra.mxu1 %vm257_vm0, %v2555_v55  ;;  %1097 = vmatpush.msrb.mxu2 %v1953_v30 }
 0x330   :  { %1138 = vmatpush.msrb.mxu3 %v1955_v31  ;;  %1618 = vmatmul.msk.f32.vlgmr.msrb.gmra.mxu2 %vm257_vm0, %v2522_v52 }
 0x331   :  { %1626 = vmatmul.msk.f32.vlgmr.msrb.gmra.mxu3 %vm257_vm0, %v2522_v52 }
 0x336   :  { %1605 = vmatmul.msk.f32.gmra.mxu0 %vm257_vm0, %v2568_v16 }
 0x337   :  { %1613 = vmatmul.msk.f32.gmra.mxu1 %vm257_vm0, %v2568_v16 }
 0x338   :  { %1619 = vmatmul.msk.f32.gmra.mxu2 %vm257_vm0, %v2545_v63 }
 0x339   :  { %1627 = vmatmul.msk.f32.gmra.mxu3 %vm257_vm0, %v2545_v63 }
 0x33e   :  { %1606 = vmatmul.msk.f32.gmra.mxu0 %vm257_vm0, %v2578_v0 }
 0x33f   :  { %1614 = vmatmul.msk.f32.gmra.mxu1 %vm257_vm0, %v2578_v0 }
 0x340   :  { %1620 = vmatmul.msk.f32.gmra.mxu2 %vm257_vm0, %v2555_v55 }
 0x341   :  { %1628 = vmatmul.msk.f32.gmra.mxu3 %vm257_vm0, %v2555_v55 }
 0x346   :  { %1607 = vmatmul.msk.f32.gmra.mxu0 %vm257_vm0, %v2588_v1 }
 0x347   :  { %1615 = vmatmul.msk.f32.gmra.mxu1 %vm257_vm0, %v2588_v1 }
 0x348   :  { %1621 = vmatmul.msk.f32.gmra.mxu2 %vm257_vm0, %v2568_v16 }
 0x349   :  { %1629 = vmatmul.msk.f32.gmra.mxu3 %vm257_vm0, %v2568_v16 }
 0x34e   :  { %1608 = vmatmul.msk.f32.gmra.mxu0 %vm257_vm0, %v2598_v10 }
 0x34f   :  { %1616 = vmatmul.msk.f32.gmra.mxu1 %vm257_vm0, %v2598_v10 }
 0x350   :  { %1622 = vmatmul.msk.f32.gmra.mxu2 %vm257_vm0, %v2578_v0 }
 0x351   :  { %1630 = vmatmul.msk.f32.gmra.mxu3 %vm257_vm0, %v2578_v0 }
 0x356   :  { %1609 = vmatmul.msk.f32.gmra.mxu0 %vm257_vm0, %v2608_v11 }
 0x357   :  { %1617 = vmatmul.msk.f32.gmra.mxu1 %vm257_vm0, %v2608_v11 }
 0x358   :  { %1623 = vmatmul.msk.f32.gmra.mxu2 %vm257_vm0, %v2588_v1 }
 0x359   :  { %1631 = vmatmul.msk.f32.gmra.mxu3 %vm257_vm0, %v2588_v1 }
 0x360   :  { %1624 = vmatmul.msk.f32.gmra.mxu2 %vm257_vm0, %v2598_v10 }
 0x361   :  { %1632 = vmatmul.msk.f32.gmra.mxu3 %vm257_vm0, %v2598_v10 }
 0x368   :  { %1625 = vmatmul.msk.f32.gmra.mxu2 %vm257_vm0, %v2608_v11 }
 0x369   :  { %1633 = vmatmul.msk.f32.gmra.mxu3 %vm257_vm0, %v2608_v11 }
 0x39b   :  { %v1017_v57 = vpop.f32.mrf.mxu0 }
 0x39c   :  { %v2779_v18 = vpop.f32.mrf.mxu1  ;;  %v1018_v31 = vadd.f32 %v1017_v57, %v2680_v22 }
 0x3a3   :  { %v1020_v23 = vpop.f32.mrf.mxu0 }
 0x3a4   :  { %v1061_v19 = vpop.f32.mrf.mxu1  ;;  %v1021_v21 = vadd.f32 %v1020_v23, %v2674_v38 }
 0x3a5   :  { %v1062_v35 = vadd.f32 %v1061_v19, %v2674_v38 }
 0x3ab   :  { %v1023_v28 = vpop.f32.mrf.mxu0 }
 0x3ac   :  { %v1064_v8 = vpop.f32.mrf.mxu1  ;;  %v1024_v48 = vadd.f32 %v1023_v28, %v2672_v26 }
 0x3ad   :  { %v1065_v20 = vadd.f32 %v1064_v8, %v2672_v26  ;;  %v1059_v8 = vadd.f32 %v2779_v18, %v2680_v22 }
 0x3b3   :  { %v1026_v33 = vpop.f32.mrf.mxu0  ;;  %v2781_v9 = vpop.f32.mrf.mxu2 }
 0x3b4   :  { %v1067_v53 = vpop.f32.mrf.mxu1  ;;  %v2783_v58 = vpop.f32.mrf.mxu3  ;;  %v1027_v36 = vadd.f32 %v1026_v33, %v2660_v54 }
 0x3b5   :  { %v1068_v46 = vadd.f32 %v1067_v53, %v2660_v54 }
 0x3bb   :  { %v1029_v43 = vpop.f32.mrf.mxu0  ;;  %v2785_v12 = vpop.f32.mrf.mxu2 }
 0x3bc   :  { %v1070_v59 = vpop.f32.mrf.mxu1  ;;  %v2787_v60 = vpop.f32.mrf.mxu3  ;;  %v1030_v61 = vadd.f32 %v1029_v43, %v2658_v2 }
 0x3bd   :  { %v1071_v6 = vadd.f32 %v1070_v59, %v2658_v2 }
 0x3c3   :  { %v1032_v17 = vpop.f32.mrf.mxu0  ;;  %v2789_v49 = vpop.f32.mrf.mxu2 }
 0x3c4   :  { %v1073_v4 = vpop.f32.mrf.mxu1  ;;  %v2791_v62 = vpop.f32.mrf.mxu3  ;;  %v1033_v32 = vadd.f32 %v1032_v17, %v2648_v14 }
 0x3c5   :  { %v1074_v25 = vadd.f32 %v1073_v4, %v2648_v14 }
 0x3cb   :  { %v1035_v5 = vpop.f32.mrf.mxu0  ;;  %v2793_v47 = vpop.f32.mrf.mxu2 }
 0x3cc   :  { %v1076_v3 = vpop.f32.mrf.mxu1  ;;  %v2795_v44 = vpop.f32.mrf.mxu3  ;;  %v1036_v37 = vadd.f32 %v1035_v5, %v2646_v56 }
 0x3cd   :  { %v1077_v45 = vadd.f32 %v1076_v3, %v2646_v56 }
 0x3d3   :  { %v1038_v7 = vpop.f32.mrf.mxu0  ;;  %v2797_v29 = vpop.f32.mrf.mxu2 }
 0x3d4   :  { %v1039_v40 = vadd.f32 %v1038_v7, %v2655_v51  ;;  %v1079_v42 = vpop.f32.mrf.mxu1  ;;  %v2801_v41 = vpop.f32.mrf.mxu3 }
 0x3d5   :  { %v1080_v13 = vadd.f32 %v1079_v42, %v2655_v51 }
 0x3d6   :  { %1956 = vtanh.f32 %v1039_v40 }
 0x3d7   :  { %1958 = vtanh.f32 %v1080_v13 }
 0x3d8   :  { %1960 = vtanh.f32 %v1036_v37 }
 0x3d9   :  { %1962 = vtanh.f32 %v1077_v45 }
 0x3da   :  { %1964 = vtanh.f32 %v1033_v32 }
 0x3db   :  { %1966 = vtanh.f32 %v1074_v25  ;;  %v1114_v50 = vpop.f32.mrf.mxu2 }
 0x3dc   :  { %v1957_v24 = vpop.eup %1956  ;;  %1968 = vtanh.f32 %v1030_v61  ;;  %v1155_v27 = vpop.f32.mrf.mxu3  ;;  %v1115_v32 = vadd.f32 %v1114_v50, %v2648_v14  ;;  %v1112_v61 = vadd.f32 %v2797_v29, %v2658_v2 }
 0x3dd   :  { %v1959_v39 = vpop.eup %1958  ;;  %1970 = vtanh.f32 %v1071_v6  ;;  %1204 = vmatpush.msra.mxu0 %v1957_v24  ;;  %v1156_v25 = vadd.f32 %v1155_v27, %v2648_v14  ;;  %v1153_v6 = vadd.f32 %v2801_v41, %v2658_v2  ;;  %v1106_v24 = vadd.f32 %v2789_v49, %v2672_v26 }
 0x3de   :  { %v1961_v34 = vpop.eup %1960  ;;  %1972 = vtanh.f32 %v1027_v36  ;;  %1245 = vmatpush.msra.mxu1 %v1959_v39  ;;  %v1109_v36 = vadd.f32 %v2793_v47, %v2660_v54  ;;  %v1147_v41 = vadd.f32 %v2791_v62, %v2672_v26  ;;  %v1100_v62 = vadd.f32 %v2781_v9, %v2680_v22 }
 0x3df   :  { %v1963_v15 = vpop.eup %1962  ;;  %1974 = vtanh.f32 %v1068_v46  ;;  %1205 = vmatpush.msra.mxu0 %v1961_v34  ;;  %v1150_v46 = vadd.f32 %v2795_v44, %v2660_v54  ;;  %v1103_v44 = vadd.f32 %v2785_v12, %v2674_v38 }
 0x3e0   :  { %v1965_v30 = vpop.eup %1964  ;;  %1976 = vtanh.f32 %v1024_v48  ;;  %1246 = vmatpush.msra.mxu1 %v1963_v15  ;;  %v1144_v48 = vadd.f32 %v2787_v60, %v2674_v38 }
 0x3e1   :  { %v1967_v28 = vpop.eup %1966  ;;  %1978 = vtanh.f32 %v1065_v20  ;;  %1206 = vmatpush.msra.mxu0 %v1965_v30  ;;  %v1141_v20 = vadd.f32 %v2783_v58, %v2680_v22 }
 0x3e2   :  { %v1969_v33 = vpop.eup %1968  ;;  %1980 = vtanh.f32 %v1021_v21  ;;  %1247 = vmatpush.msra.mxu1 %v1967_v28 }
 0x3e3   :  { %v1971_v23 = vpop.eup %1970  ;;  %1982 = vtanh.f32 %v1062_v35  ;;  %v1117_v53 = vpop.f32.mrf.mxu2  ;;  %1207 = vmatpush.msra.mxu0 %v1969_v33 }
 0x3e4   :  { %v1973_v19 = vpop.eup %1972  ;;  %1984 = vtanh.f32 %v1018_v31  ;;  %v1158_v43 = vpop.f32.mrf.mxu3  ;;  %1248 = vmatpush.msra.mxu1 %v1971_v23  ;;  %v1118_v37 = vadd.f32 %v1117_v53, %v2646_v56 }
 0x3e5   :  { %v1975_v57 = vpop.eup %1974  ;;  %1986 = vtanh.f32 %v1059_v8  ;;  %1208 = vmatpush.msra.mxu0 %v1973_v19  ;;  %v1159_v45 = vadd.f32 %v1158_v43, %v2646_v56 }
 0x3e6   :  { %v1977_v59 = vpop.eup %1976  ;;  %1249 = vmatpush.msra.mxu1 %v1975_v57 }
 0x3e7   :  { %v1979_v17 = vpop.eup %1978  ;;  %1209 = vmatpush.msra.mxu0 %v1977_v59 }
 0x3e8   :  { %v1981_v18 = vpop.eup %1980  ;;  %1250 = vmatpush.msra.mxu1 %v1979_v17 }
 0x3e9   :  { %v1983_v4 = vpop.eup %1982  ;;  %1210 = vmatpush.msra.mxu0 %v1981_v18 }
 0x3ea   :  { %v1985_v5 = vpop.eup %1984  ;;  %1251 = vmatpush.msra.mxu1 %v1983_v4 }
 0x3eb   :  { %v1987_v3 = vpop.eup %1986  ;;  %v1120_v7 = vpop.f32.mrf.mxu2  ;;  %1211 = vmatpush.msra.mxu0 %v1985_v5 }
 0x3ec   :  { %v1121_v40 = vadd.f32 %v1120_v7, %v2655_v51  ;;  %v1161_v42 = vpop.f32.mrf.mxu3  ;;  %1252 = vmatpush.msra.mxu1 %v1987_v3  ;;  %1634 = vmatmul.msk.f32.vlgmr.msra.gmra.mxu0 %vm257_vm0, %v2522_v52 }
 0x3ed   :  { %v1162_v13 = vadd.f32 %v1161_v42, %v2655_v51  ;;  %1642 = vmatmul.msk.f32.vlgmr.msra.gmra.mxu1 %vm257_vm0, %v2522_v52 }
 0x3ee   :  { %1988 = vtanh.f32 %v1121_v40 }
 0x3ef   :  { %1990 = vtanh.f32 %v1162_v13 }
 0x3f0   :  { %1992 = vtanh.f32 %v1118_v37 }
 0x3f1   :  { %1994 = vtanh.f32 %v1159_v45 }
 0x3f2   :  { %1996 = vtanh.f32 %v1115_v32 }
 0x3f3   :  { %1998 = vtanh.f32 %v1156_v25 }
 0x3f4   :  { %v1989_v50 = vpop.eup %1988  ;;  %2000 = vtanh.f32 %v1112_v61  ;;  %1635 = vmatmul.msk.f32.gmra.mxu0 %vm257_vm0, %v2545_v63 }
 0x3f5   :  { %v1991_v29 = vpop.eup %1990  ;;  %2002 = vtanh.f32 %v1153_v6  ;;  %1643 = vmatmul.msk.f32.gmra.mxu1 %vm257_vm0, %v2545_v63  ;;  %1286 = vmatpush.msra.mxu2 %v1989_v50 }
 0x3f6   :  { %v1993_v47 = vpop.eup %1992  ;;  %2004 = vtanh.f32 %v1109_v36  ;;  %1327 = vmatpush.msra.mxu3 %v1991_v29 }
 0x3f7   :  { %v1995_v49 = vpop.eup %1994  ;;  %2006 = vtanh.f32 %v1150_v46  ;;  %1287 = vmatpush.msra.mxu2 %v1993_v47 }
 0x3f8   :  { %v1997_v27 = vpop.eup %1996  ;;  %2008 = vtanh.f32 %v1106_v24  ;;  %1328 = vmatpush.msra.mxu3 %v1995_v49 }
 0x3f9   :  { %v1999_v39 = vpop.eup %1998  ;;  %2010 = vtanh.f32 %v1147_v41  ;;  %1288 = vmatpush.msra.mxu2 %v1997_v27 }
 0x3fa   :  { %v2001_v12 = vpop.eup %2000  ;;  %2012 = vtanh.f32 %v1103_v44  ;;  %1329 = vmatpush.msra.mxu3 %v1999_v39 }
 0x3fb   :  { %v2003_v34 = vpop.eup %2002  ;;  %2014 = vtanh.f32 %v1144_v48  ;;  %1289 = vmatpush.msra.mxu2 %v2001_v12 }
 0x3fc   :  { %v2005_v60 = vpop.eup %2004  ;;  %2016 = vtanh.f32 %v1100_v62  ;;  %1330 = vmatpush.msra.mxu3 %v2003_v34  ;;  %1636 = vmatmul.msk.f32.gmra.mxu0 %vm257_vm0, %v2555_v55 }
 0x3fd   :  { %v2007_v9 = vpop.eup %2006  ;;  %2018 = vtanh.f32 %v1141_v20  ;;  %1644 = vmatmul.msk.f32.gmra.mxu1 %vm257_vm0, %v2555_v55  ;;  %1290 = vmatpush.msra.mxu2 %v2005_v60 }
 0x3fe   :  { %v2009_v58 = vpop.eup %2008  ;;  %1331 = vmatpush.msra.mxu3 %v2007_v9 }
 0x3ff   :  { %v2011_v21 = vpop.eup %2010  ;;  %1291 = vmatpush.msra.mxu2 %v2009_v58 }
 0x400   :  { %v2013_v15 = vpop.eup %2012  ;;  %1332 = vmatpush.msra.mxu3 %v2011_v21 }
 0x401   :  { %v2015_v35 = vpop.eup %2014  ;;  %1292 = vmatpush.msra.mxu2 %v2013_v15 }
 0x402   :  { %v2017_v30 = vpop.eup %2016  ;;  %1333 = vmatpush.msra.mxu3 %v2015_v35 }
 0x403   :  { %v2019_v31 = vpop.eup %2018  ;;  %1293 = vmatpush.msra.mxu2 %v2017_v30 }
 0x404   :  { %1334 = vmatpush.msra.mxu3 %v2019_v31  ;;  %1637 = vmatmul.msk.f32.gmra.mxu0 %vm257_vm0, %v2568_v16 }
 0x405   :  { %1645 = vmatmul.msk.f32.gmra.mxu1 %vm257_vm0, %v2568_v16  ;;  %1650 = vmatmul.msk.f32.vlgmr.msra.gmra.mxu2 %vm257_vm0, %v2522_v52 }
 0x406   :  { %1658 = vmatmul.msk.f32.vlgmr.msra.gmra.mxu3 %vm257_vm0, %v2522_v52 }
 0x40c   :  { %1638 = vmatmul.msk.f32.gmra.mxu0 %vm257_vm0, %v2578_v0 }
 0x40d   :  { %1646 = vmatmul.msk.f32.gmra.mxu1 %vm257_vm0, %v2578_v0  ;;  %1651 = vmatmul.msk.f32.gmra.mxu2 %vm257_vm0, %v2545_v63 }
 0x40e   :  { %1659 = vmatmul.msk.f32.gmra.mxu3 %vm257_vm0, %v2545_v63 }
 0x414   :  { %1639 = vmatmul.msk.f32.gmra.mxu0 %vm257_vm0, %v2588_v1 }
 0x415   :  { %1647 = vmatmul.msk.f32.gmra.mxu1 %vm257_vm0, %v2588_v1  ;;  %1652 = vmatmul.msk.f32.gmra.mxu2 %vm257_vm0, %v2555_v55 }
 0x416   :  { %1660 = vmatmul.msk.f32.gmra.mxu3 %vm257_vm0, %v2555_v55 }
 0x41c   :  { %1640 = vmatmul.msk.f32.gmra.mxu0 %vm257_vm0, %v2598_v10 }
 0x41d   :  { %1648 = vmatmul.msk.f32.gmra.mxu1 %vm257_vm0, %v2598_v10  ;;  %1653 = vmatmul.msk.f32.gmra.mxu2 %vm257_vm0, %v2568_v16 }
 0x41e   :  { %1661 = vmatmul.msk.f32.gmra.mxu3 %vm257_vm0, %v2568_v16 }
 0x424   :  { %1641 = vmatmul.msk.f32.gmra.mxu0 %vm257_vm0, %v2608_v11 }
 0x425   :  { %1649 = vmatmul.msk.f32.gmra.mxu1 %vm257_vm0, %v2608_v11  ;;  %1654 = vmatmul.msk.f32.gmra.mxu2 %vm257_vm0, %v2578_v0 }
 0x426   :  { %1662 = vmatmul.msk.f32.gmra.mxu3 %vm257_vm0, %v2578_v0 }
 0x42d   :  { %1655 = vmatmul.msk.f32.gmra.mxu2 %vm257_vm0, %v2588_v1 }
 0x42e   :  { %1663 = vmatmul.msk.f32.gmra.mxu3 %vm257_vm0, %v2588_v1 }
 0x435   :  { %1656 = vmatmul.msk.f32.gmra.mxu2 %vm257_vm0, %v2598_v10 }
 0x436   :  { %1664 = vmatmul.msk.f32.gmra.mxu3 %vm257_vm0, %v2598_v10 }
 0x43d   :  { %1657 = vmatmul.msk.f32.gmra.mxu2 %vm257_vm0, %v2608_v11 }
 0x43e   :  { %1665 = vmatmul.msk.f32.gmra.mxu3 %vm257_vm0, %v2608_v11 }
 0x469   :  { %v1213_v52 = vpop.f32.mrf.mxu0 }
 0x46a   :  { %v1254_v63 = vpop.f32.mrf.mxu1  ;;  %v1214_v20 = vadd.f32 %v1213_v52, %v2680_v22 }
 0x46b   :  { %v1255_v34 = vadd.f32 %v1254_v63, %v2680_v22 }
 0x471   :  { %v1216_v55 = vpop.f32.mrf.mxu0 }
 0x472   :  { %v1257_v16 = vpop.f32.mrf.mxu1  ;;  %v1217_v48 = vadd.f32 %v1216_v55, %v2674_v38 }
 0x473   :  { %v1258_v62 = vadd.f32 %v1257_v16, %v2674_v38 }
 0x479   :  { %v1219_v0 = vpop.f32.mrf.mxu0 }
 0x47a   :  { %v1260_v28 = vpop.f32.mrf.mxu1  ;;  %v1220_v41 = vadd.f32 %v1219_v0, %v2672_v26 }
 0x47b   :  { %v1261_v44 = vadd.f32 %v1260_v28, %v2672_v26 }
 0x481   :  { %v1222_v8 = vpop.f32.mrf.mxu0 }
 0x482   :  { %v1263_v1 = vpop.f32.mrf.mxu1  ;;  %v1223_v46 = vadd.f32 %v1222_v8, %v2660_v54  ;;  %v2944_v8 = vld [vmem:[#allocation2 + $0xc0] sm:$0xff] }
 0x483   :  { %v1264_v24 = vadd.f32 %v1263_v1, %v2660_v54  ;;  %v38_v1 = vld [vmem:[%s2987_s1] sm:$0x1] }
 0x488   :  { %v2908_v33 = vpop.f32.mrf.mxu2 }
 0x489   :  { %v2910_v23 = vpop.f32.mrf.mxu3  ;;  %v1225_v53 = vpop.f32.mrf.mxu0 }
 0x48a   :  { %v1266_v10 = vpop.f32.mrf.mxu1  ;;  %v1226_v61 = vadd.f32 %v1225_v53, %v2658_v2  ;;  %v2126_v53 = vmov 5  }
 0x48b   :  { %v1267_v6 = vadd.f32 %v1266_v10, %v2658_v2  ;;  %1699 = vset.pattern.permute.xlu0 %v2126_v53 }
 0x48c   :  { %1396 = vperm.xlu0 %1699, %v38_v1  }
 0x490   :  { %v2912_v19 = vpop.f32.mrf.mxu2 }
 0x491   :  { %v2914_v43 = vpop.f32.mrf.mxu3  ;;  %v1228_v57 = vpop.f32.mrf.mxu0 }
 0x492   :  { %v1269_v11 = vpop.f32.mrf.mxu1  ;;  %v1229_v32 = vadd.f32 %v1228_v57, %v2648_v14 }
 0x493   :  { %v1270_v25 = vadd.f32 %v1269_v11, %v2648_v14 }
 0x498   :  { %v2916_v59 = vpop.f32.mrf.mxu2 }
 0x499   :  { %v2918_v17 = vpop.f32.mrf.mxu3  ;;  %v1231_v18 = vpop.f32.mrf.mxu0 }
 0x49a   :  { %v1272_v4 = vpop.f32.mrf.mxu1  ;;  %v1232_v42 = vadd.f32 %v1231_v18, %v2646_v56 }
 0x49b   :  { %v1273_v13 = vadd.f32 %v1272_v4, %v2646_v56 }
 0x4a0   :  { %v2920_v5 = vpop.f32.mrf.mxu2 }
 0x4a1   :  { %v2922_v3 = vpop.f32.mrf.mxu3  ;;  %v1234_v7 = vpop.f32.mrf.mxu0 }
 0x4a2   :  { %v1235_v37 = vadd.f32 %v1234_v7, %v2655_v51  ;;  %v1275_v40 = vpop.f32.mrf.mxu1 }
 0x4a3   :  { %v1276_v45 = vadd.f32 %v1275_v40, %v2655_v51 }
 0x4a4   :  { %2020 = vtanh.f32 %v1235_v37 }
 0x4a5   :  { %2022 = vtanh.f32 %v1276_v45 }
 0x4a6   :  { %2024 = vtanh.f32 %v1232_v42 }
 0x4a7   :  { %2026 = vtanh.f32 %v1273_v13  ;;  %v1305_v13 = vadd.f32 %v2920_v5, %v2660_v54  ;;  %v1299_v5 = vadd.f32 %v2912_v19, %v2674_v38 }
 0x4a8   :  { %v2932_v36 = vpop.f32.mrf.mxu2  ;;  %2028 = vtanh.f32 %v1229_v32 }
 0x4a9   :  { %v2935_v50 = vpop.f32.mrf.mxu3  ;;  %2030 = vtanh.f32 %v1270_v25  ;;  %v1308_v42 = vadd.f32 %v2932_v36, %v2658_v2  ;;  %v1343_v25 = vadd.f32 %v2918_v17, %v2672_v26  ;;  %v1337_v17 = vadd.f32 %v2910_v23, %v2680_v22 }
 0x4aa   :  { %v2021_v29 = vpop.eup %2020  ;;  %2032 = vtanh.f32 %v1226_v61  ;;  %v1349_v45 = vadd.f32 %v2935_v50, %v2658_v2 }
 0x4ab   :  { %v2023_v47 = vpop.eup %2022  ;;  %2034 = vtanh.f32 %v1267_v6  ;;  %1410 = vmatpush.msrb.mxu0 %v2021_v29 }
 0x4ac   :  { %v2025_v49 = vpop.eup %2024  ;;  %2036 = vtanh.f32 %v1223_v46  ;;  %1430 = vmatpush.msrb.mxu1 %v2023_v47 }
 0x4ad   :  { %v2027_v27 = vpop.eup %2026  ;;  %2038 = vtanh.f32 %v1264_v24  ;;  %1411 = vmatpush.msrb.mxu0 %v2025_v49 }
 0x4ae   :  { %v2029_v39 = vpop.eup %2028  ;;  %2040 = vtanh.f32 %v1220_v41  ;;  %1431 = vmatpush.msrb.mxu1 %v2027_v27  ;;  %v1496_v27 = vlaneseq }
 0x4af   :  { %v2031_v12 = vpop.eup %2030  ;;  %2042 = vtanh.f32 %v1261_v44  ;;  %1412 = vmatpush.msrb.mxu0 %v2029_v39 }
 0x4b0   :  { %v1310_v60 = vpop.f32.mrf.mxu2  ;;  %v2033_v9 = vpop.eup %2032  ;;  %2044 = vtanh.f32 %v1217_v48  ;;  %1432 = vmatpush.msrb.mxu1 %v2031_v12  ;;  %vm1498_vm4 = vcmp.lt.s32.totalorder %v1496_v27, 512 }
 0x4b1   :  { %v1351_v58 = vpop.f32.mrf.mxu3  ;;  %v2035_v21 = vpop.eup %2034  ;;  %2046 = vtanh.f32 %v1258_v62  ;;  %1413 = vmatpush.msrb.mxu0 %v2033_v9  ;;  %v1311_v37 = vadd.f32 %v1310_v60, %v2648_v14 }
 0x4b2   :  { %v2037_v15 = vpop.eup %2036  ;;  %2048 = vtanh.f32 %v1214_v20  ;;  %1433 = vmatpush.msrb.mxu1 %v2035_v21  ;;  %v1352_v40 = vadd.f32 %v1351_v58, %v2648_v14  ;;  %v1302_v14 = vadd.f32 %v2916_v59, %v2672_v26 }
 0x4b3   :  { %v2039_v35 = vpop.eup %2038  ;;  %2050 = vtanh.f32 %v1255_v34  ;;  %1414 = vmatpush.msrb.mxu0 %v2037_v15 }
 0x4b4   :  { %v2041_v30 = vpop.eup %2040  ;;  %1434 = vmatpush.msrb.mxu1 %v2039_v35 }
 0x4b5   :  { %v2043_v31 = vpop.eup %2042  ;;  %1415 = vmatpush.msrb.mxu0 %v2041_v30 }
 0x4b6   :  { %v2045_v52 = vpop.eup %2044  ;;  %1435 = vmatpush.msrb.mxu1 %v2043_v31 }
 0x4b7   :  { %v2047_v63 = vpop.eup %2046  ;;  %1416 = vmatpush.msrb.mxu0 %v2045_v52 }
 0x4b8   :  { %v1313_v55 = vpop.f32.mrf.mxu2  ;;  %v2049_v16 = vpop.eup %2048  ;;  %1436 = vmatpush.msrb.mxu1 %v2047_v63 }
 0x4b9   :  { %v1354_v0 = vpop.f32.mrf.mxu3  ;;  %v2051_v28 = vpop.eup %2050  ;;  %1417 = vmatpush.msrb.mxu0 %v2049_v16  ;;  %v1314_v57 = vadd.f32 %v1313_v55, %v2646_v56 }
 0x4ba   :  { %1437 = vmatpush.msrb.mxu1 %v2051_v28  ;;  %1666 = vmatmul.msk.f32.vlgmr.msrb.gmra.mxu0 %vm257_vm0, %v2944_v8  ;;  %v1355_v4 = vadd.f32 %v1354_v0, %v2646_v56  ;;  %v1346_v56 = vadd.f32 %v2922_v3, %v2660_v54  ;;  %v1340_v54 = vadd.f32 %v2914_v43, %v2674_v38 }
 0x4bb   :  { %1667 = vmatmul.msk.f32.vlgmr.msrb.gmra.mxu1 %vm257_vm0, %v2944_v8  ;;  %v1296_v3 = vadd.f32 %v2908_v33, %v2680_v22 }
 0x4c0   :  { %v1316_v10 = vpop.f32.mrf.mxu2 }
 0x4c1   :  { %v1317_v11 = vadd.f32 %v1316_v10, %v2655_v51  ;;  %v1357_v18 = vpop.f32.mrf.mxu3 }
 0x4c2   :  { %v1358_v7 = vadd.f32 %v1357_v18, %v2655_v51 }
 0x4c3   :  { %2052 = vtanh.f32 %v1317_v11 }
 0x4c4   :  { %2054 = vtanh.f32 %v1358_v7 }
 0x4c5   :  { %2056 = vtanh.f32 %v1314_v57 }
 0x4c6   :  { %2058 = vtanh.f32 %v1355_v4 }
 0x4c7   :  { %2060 = vtanh.f32 %v1311_v37 }
 0x4c8   :  { %2062 = vtanh.f32 %v1352_v40 }
 0x4c9   :  { %v2053_v51 = vpop.eup %2052  ;;  %2064 = vtanh.f32 %v1308_v42 }
 0x4ca   :  { %v2055_v32 = vpop.eup %2054  ;;  %2066 = vtanh.f32 %v1349_v45  ;;  %1450 = vmatpush.msrb.mxu2 %v2053_v51 }
 0x4cb   :  { %v2057_v2 = vpop.eup %2056  ;;  %2068 = vtanh.f32 %v1305_v13  ;;  %1470 = vmatpush.msrb.mxu3 %v2055_v32 }
 0x4cc   :  { %v2059_v61 = vpop.eup %2058  ;;  %2070 = vtanh.f32 %v1346_v56  ;;  %1451 = vmatpush.msrb.mxu2 %v2057_v2 }
 0x4cd   :  { %v2061_v59 = vpop.eup %2060  ;;  %2072 = vtanh.f32 %v1302_v14  ;;  %1471 = vmatpush.msrb.mxu3 %v2059_v61 }
 0x4ce   :  { %v2063_v26 = vpop.eup %2062  ;;  %2074 = vtanh.f32 %v1343_v25  ;;  %1452 = vmatpush.msrb.mxu2 %v2061_v59 }
 0x4cf   :  { %v2065_v19 = vpop.eup %2064  ;;  %2076 = vtanh.f32 %v1299_v5  ;;  %1472 = vmatpush.msrb.mxu3 %v2063_v26 }
 0x4d0   :  { %v2067_v6 = vpop.eup %2066  ;;  %2078 = vtanh.f32 %v1340_v54  ;;  %1453 = vmatpush.msrb.mxu2 %v2065_v19 }
 0x4d1   :  { %v2069_v38 = vpop.eup %2068  ;;  %2080 = vtanh.f32 %v1296_v3  ;;  %1473 = vmatpush.msrb.mxu3 %v2067_v6 }
 0x4d2   :  { %v2071_v43 = vpop.eup %2070  ;;  %2082 = vtanh.f32 %v1337_v17  ;;  %1454 = vmatpush.msrb.mxu2 %v2069_v38 }
 0x4d3   :  { %v2073_v33 = vpop.eup %2072  ;;  %1474 = vmatpush.msrb.mxu3 %v2071_v43 }
 0x4d4   :  { %v2075_v36 = vpop.eup %2074  ;;  %1455 = vmatpush.msrb.mxu2 %v2073_v33 }
 0x4d5   :  { %v2077_v46 = vpop.eup %2076  ;;  %1475 = vmatpush.msrb.mxu3 %v2075_v36 }
 0x4d6   :  { %v2079_v22 = vpop.eup %2078  ;;  %1456 = vmatpush.msrb.mxu2 %v2077_v46 }
 0x4d7   :  { %v2081_v23 = vpop.eup %2080  ;;  %1476 = vmatpush.msrb.mxu3 %v2079_v22 }
 0x4d8   :  { %v2083_v50 = vpop.eup %2082  ;;  %1457 = vmatpush.msrb.mxu2 %v2081_v23 }
 0x4d9   :  { %1477 = vmatpush.msrb.mxu3 %v2083_v50  ;;  %1668 = vmatmul.msk.f32.vlgmr.msrb.gmra.mxu2 %vm257_vm0, %v2944_v8 }
 0x4da   :  { %1669 = vmatmul.msk.f32.vlgmr.msrb.gmra.mxu3 %vm257_vm0, %v2944_v8 }
 0x4fe   :  { %v1397_v24 = vpop.permute.xlu0 %1396 }
 0x537   :  { %v1419_v47 = vpop.f32.mrf.mxu0 }
 0x538   :  { %v1439_v29 = vpop.f32.mrf.mxu1  ;;  %v1420_v20 = vadd.f32 %v1419_v47, %v1397_v24 }
 0x539   :  { %v1440_v41 = vadd.f32 %v1439_v29, %v1397_v24 }
 0x53b   :  { %v1486_v62 = vrot.slane %v1440_v41, 7 }
 0x53d   :  { %v1490_v9 = vsel %vm1489_vm2, %v1420_v20, %v1486_v62 }
 0x55c   :  { %v1459_v44 = vpop.f32.mrf.mxu2 }
 0x55d   :  { %v1460_v49 = vadd.f32 %v1459_v44, %v1397_v24  ;;  %v1479_v48 = vpop.f32.mrf.mxu3 }
 0x55e   :  { %v1480_v39 = vadd.f32 %v1479_v48, %v1397_v24 }
 0x55f   :  { %v1487_v12 = vrot.slane %v1460_v49, 6 }
 0x560   :  { %v1488_v34 = vrot.slane %v1480_v39, 5 }
 0x562   :  { %v1492_v60 = vsel %vm1491_vm1, %v1487_v12, %v1488_v34 }
 0x563   :  { %v1494_v58 = vsel %vm1493_vm3, %v1490_v9, %v1492_v60 }
 0x564   :  { %1500 = vst.msk [vmem:[%s2989_s3] sm:$0xf] %vm1498_vm4, %v1494_v58 }
 0x565   :  { %1505 = vsyncpa [#allocation3], 1 }

</bundles_post_ra>
